<compile_context>
chip_gen: v7x
topology: tpu7x:2x2x1
jax: 0.10.0
libtpu: 0.0.40
codegen_flags: <defaults>
</compile_context>

<pallas_src>
from functools import partial

import jax
import jax.numpy as jnp
from jax import lax
from jax.experimental import pallas as pl
from jax.experimental.pallas import tpu as pltpu


def generator_kernel(z_ref,
                     wih0_ref, whh0_ref, b0_ref,
                     wih1_ref, whh1_ref, b1_ref,
                     wout_ref, bout_ref,
                     out_ref,
                     xproj_scr, h1_scr,
                     *, seq_len, batch_pad):
    H = whh0_ref.shape[0]
    Bp = batch_pad

    # ---- hoisted, loop-invariant work --------------------------------------
    whh0 = whh0_ref[...]                                   # (H, 4H)
    whh1 = whh1_ref[...]                                   # (H, 4H)
    wih1 = wih1_ref[...]                                   # (H, 4H)
    b1b = jnp.broadcast_to(b1_ref[...], (Bp, 4 * H))       # (Bp, 4H)
    wout = wout_ref[...]                                   # (H, Cp) lane-dense
    bout = bout_ref[...]                                   # (1, Cp)

    # Layer-0 input projection for all timesteps: one batched MXU call.
    xproj_scr[...] = (
        jnp.dot(z_ref[...], wih0_ref[...], preferred_element_type=jnp.float32)
        + b0_ref[...])

    def gate_act(gates):
        # Full-width transcendentals on the (Bp, 4H) vreg, then static slices.
        sg = jax.nn.sigmoid(gates)
        th = jnp.tanh(gates)
        return (sg[:, 0 * H:1 * H], sg[:, 1 * H:2 * H],
                th[:, 2 * H:3 * H], sg[:, 3 * H:4 * H])

    # ---- recurrence --------------------------------------------------------
    def step(t, carry):
        h0, c0, h1, c1 = carry
        row = pl.multiple_of(t * Bp, Bp)   # Bp is a multiple of 8 -> aligned rows

        # Both recurrence dots depend only on the previous carry: issue them
        # back-to-back at the top of the step so they pipeline through the MXU
        # before any EUP/VPU gate math (shortens the serial dependency chain).
        r0 = jnp.dot(h0, whh0, preferred_element_type=jnp.float32)
        r1 = jnp.dot(h1, whh1, preferred_element_type=jnp.float32)

        # Layer 0 (input projection precomputed).
        g0 = xproj_scr[pl.ds(row, Bp), :] + r0
        i0, f0, gg0, o0 = gate_act(g0)
        c0 = f0 * c0 + i0 * gg0
        h0 = o0 * jnp.tanh(c0)

        # Layer 1 (recurrent term r1 already in flight).
        g1 = jnp.dot(h0, wih1, preferred_element_type=jnp.float32) + r1 + b1b
        i1, f1, gg1, o1 = gate_act(g1)
        c1 = f1 * c1 + i1 * gg1
        h1 = o1 * jnp.tanh(c1)

        h1_scr[pl.ds(row, Bp), :] = h1
        return (h0, c0, h1, c1)

    zeros = jnp.zeros((Bp, H), jnp.float32)
    unroll = True if seq_len <= 16 else 4   # bound vreg pressure on long sequences
    lax.fori_loop(0, seq_len, step, (zeros, zeros, zeros, zeros), unroll=unroll)

    # ---- deferred, lane-dense output head ----------------------------------
    # One (T*Bp, H) @ (H, Cp=128) matmul + one unmasked bulk store.
    out_ref[...] = (
        jnp.dot(h1_scr[...], wout, preferred_element_type=jnp.float32) + bout)


def _vmem_spec():
    return pl.BlockSpec(memory_space=pltpu.MemorySpace.VMEM)


def generator_forward(z, params):
    """z: (B, T, D) float32 -> (B, T, C) float32 (batch_first, like the module)."""
    (wih0_t, whh0_t, b0, wih1_t, whh1_t, b1, wout_t, bout) = params
    B, T, D = z.shape
    H = whh0_t.shape[0]
    C = wout_t.shape[1]

    # Pad batch to the 8-row sublane width, go time-major, and flatten to 2D so
    # every kernel-side access is tile-aligned with zero in-kernel reshapes.
    Bp = ((B + 7) // 8) * 8
    # Lane-dense output width: pad the tiny head (C=2) to 128 lanes so the final
    # store is a full vst instead of a 2-of-128-lane masked store.
    Cp = max(128, ((C + 127) // 128) * 128)

    z_tm = jnp.transpose(z, (1, 0, 2))                               # (T, B, D)
    if Bp != B:
        z_tm = jnp.pad(z_tm, ((0, 0), (0, Bp - B), (0, 0)))
    z_flat = z_tm.reshape(T * Bp, D)                                 # (T*Bp, D)

    wout_p = jnp.pad(wout_t, ((0, 0), (0, Cp - C)))                  # (H, Cp)
    bout_p = jnp.pad(bout, ((0, 0), (0, Cp - C)))                    # (1, Cp)

    inputs = (z_flat, wih0_t, whh0_t, b0, wih1_t, whh1_t, b1, wout_p, bout_p)
    out_flat = pl.pallas_call(
        partial(generator_kernel, seq_len=T, batch_pad=Bp),
        out_shape=jax.ShapeDtypeStruct((T * Bp, Cp), jnp.float32),
        in_specs=[_vmem_spec() for _ in inputs],
        out_specs=_vmem_spec(),
        scratch_shapes=[pltpu.VMEM((T * Bp, 4 * H), jnp.float32),   # hoisted x-proj
                        pltpu.VMEM((T * Bp, H), jnp.float32)],      # h1 history
    )(*inputs)

    out = out_flat.reshape(T, Bp, Cp)[:, :B, :C]                     # (T, B, C)
    return jnp.transpose(out, (1, 0, 2))                             # (B, T, C)


def make_params(key, latent_dim, hidden_dim, num_cont_var):
    """Deterministic synthetic parameters matching nn.LSTM / nn.Linear shapes."""
    H = hidden_dim
    k = 1.0 / jnp.sqrt(jnp.float32(H))
    ks = jax.random.split(key, 12)

    def u(kk, shape):
        return jax.random.uniform(kk, shape, jnp.float32, minval=-k, maxval=k)

    # layer 0
    wih0 = u(ks[0], (4 * H, latent_dim))
    whh0 = u(ks[1], (4 * H, H))
    bih0 = u(ks[2], (4 * H,))
    bhh0 = u(ks[3], (4 * H,))
    # layer 1
    wih1 = u(ks[4], (4 * H, H))
    whh1 = u(ks[5], (4 * H, H))
    bih1 = u(ks[6], (4 * H,))
    bhh1 = u(ks[7], (4 * H,))
    # linear head (trunc_normal init as in the module)
    wout = jax.random.truncated_normal(ks[8], -2.0, 2.0, (num_cont_var, H), jnp.float32)
    bout = jax.random.truncated_normal(ks[9], -2.0, 2.0, (num_cont_var,), jnp.float32)

    return (wih0.T, whh0.T, (bih0 + bhh0).reshape(1, 4 * H),
            wih1.T, whh1.T, (bih1 + bhh1).reshape(1, 4 * H),
            wout.T, bout.reshape(1, num_cont_var))


def generator_reference(z, params):
    """Pure-JAX reference of the same math (eval-mode LSTM + Linear)."""
    (wih0_t, whh0_t, b0, wih1_t, whh1_t, b1, wout_t, bout) = params
    B, T, D = z.shape
    H = whh0_t.shape[0]

    def cell(x, h, c, wih, whh, b):
        g = x @ wih + h @ whh + b
        i = jax.nn.sigmoid(g[:, 0 * H:1 * H])
        f = jax.nn.sigmoid(g[:, 1 * H:2 * H])
        gg = jnp.tanh(g[:, 2 * H:3 * H])
        o = jax.nn.sigmoid(g[:, 3 * H:4 * H])
        c = f * c + i * gg
        h = o * jnp.tanh(c)
        return h, c

    h0 = c0 = h1 = c1 = jnp.zeros((B, H), jnp.float32)
    outs = []
    for t in range(T):
        h0, c0 = cell(z[:, t, :], h0, c0, wih0_t, whh0_t, b0)
        h1, c1 = cell(h0, h1, c1, wih1_t, whh1_t, b1)
        outs.append(h1 @ wout_t + bout)
    return jnp.stack(outs, axis=1)


if __name__ == "__main__":
    latent_dim, hidden_dim, num_cont_var = 4, 32, 2
    B, T = 2, 8

    key = jax.random.PRNGKey(0)
    k_z, k_p = jax.random.split(key)
    z = jax.random.normal(k_z, (B, T, latent_dim), jnp.float32)
    params = make_params(k_p, latent_dim, hidden_dim, num_cont_var)

    out = jax.block_until_ready(generator_forward(z, params))
    ref = jax.block_until_ready(generator_reference(z, params))

    assert out.shape == (B, T, num_cont_var)
    assert jnp.allclose(out, ref, rtol=1e-4, atol=1e-4), "mismatch vs reference"
    print("KERNEL_OK")
</pallas_src>

<mosaic_0001>
module attributes {stable_mosaic.version = 11 : i64} {
  func.func @generator_kernel(%arg0: memref<64x4xf32, #tpu.memory_space<vmem>>, %arg1: memref<4x128xf32, #tpu.memory_space<vmem>>, %arg2: memref<32x128xf32, #tpu.memory_space<vmem>>, %arg3: memref<1x128xf32, #tpu.memory_space<vmem>>, %arg4: memref<32x128xf32, #tpu.memory_space<vmem>>, %arg5: memref<32x128xf32, #tpu.memory_space<vmem>>, %arg6: memref<1x128xf32, #tpu.memory_space<vmem>>, %arg7: memref<32x128xf32, #tpu.memory_space<vmem>>, %arg8: memref<1x128xf32, #tpu.memory_space<vmem>>, %arg9: memref<64x128xf32, #tpu.memory_space<vmem>>, %arg10: memref<64x128xf32, #tpu.memory_space<vmem>>, %arg11: memref<64x32xf32, #tpu.memory_space<vmem>>) attributes {dimension_semantics = [], scalar_prefetch = 0 : i64, scratch_operands = 2 : i64, tpu.core_type = #tpu.core_type<tc>} {
    %c0 = arith.constant 0 : index
    %c0_0 = arith.constant 0 : index
    %0 = vector.load %arg2[%c0, %c0_0] : memref<32x128xf32, #tpu.memory_space<vmem>>, vector<32x128xf32>
    %c0_1 = arith.constant 0 : index
    %c0_2 = arith.constant 0 : index
    %1 = vector.load %arg5[%c0_1, %c0_2] : memref<32x128xf32, #tpu.memory_space<vmem>>, vector<32x128xf32>
    %c0_3 = arith.constant 0 : index
    %c0_4 = arith.constant 0 : index
    %2 = vector.load %arg4[%c0_3, %c0_4] : memref<32x128xf32, #tpu.memory_space<vmem>>, vector<32x128xf32>
    %c0_5 = arith.constant 0 : index
    %c0_6 = arith.constant 0 : index
    %3 = vector.load %arg6[%c0_5, %c0_6] : memref<1x128xf32, #tpu.memory_space<vmem>>, vector<1x128xf32>
    %4 = vector.shape_cast %3 : vector<1x128xf32> to vector<1x128xf32>
    %5 = vector.broadcast %4 : vector<1x128xf32> to vector<8x128xf32>
    %c0_7 = arith.constant 0 : index
    %c0_8 = arith.constant 0 : index
    %6 = vector.load %arg7[%c0_7, %c0_8] : memref<32x128xf32, #tpu.memory_space<vmem>>, vector<32x128xf32>
    %c0_9 = arith.constant 0 : index
    %c0_10 = arith.constant 0 : index
    %7 = vector.load %arg8[%c0_9, %c0_10] : memref<1x128xf32, #tpu.memory_space<vmem>>, vector<1x128xf32>
    %c0_11 = arith.constant 0 : index
    %c0_12 = arith.constant 0 : index
    %8 = vector.load %arg0[%c0_11, %c0_12] : memref<64x4xf32, #tpu.memory_space<vmem>>, vector<64x4xf32>
    %c0_13 = arith.constant 0 : index
    %c0_14 = arith.constant 0 : index
    %9 = vector.load %arg1[%c0_13, %c0_14] : memref<4x128xf32, #tpu.memory_space<vmem>>, vector<4x128xf32>
    %cst = arith.constant dense<0.000000e+00> : vector<64x128xf32>
    %10 = tpu.matmul %8, %9, %cst {dimension_numbers = #tpu.dot_dimension_numbers<[1], [0], [0], [1], [0, 0, 1, 1], [], []>} : vector<64x4xf32>, vector<4x128xf32>, vector<64x128xf32> -> vector<64x128xf32>
    %c0_15 = arith.constant 0 : index
    %c0_16 = arith.constant 0 : index
    %11 = vector.load %arg3[%c0_15, %c0_16] : memref<1x128xf32, #tpu.memory_space<vmem>>, vector<1x128xf32>
    %12 = vector.broadcast %11 : vector<1x128xf32> to vector<64x128xf32>
    %13 = arith.addf %10, %12 : vector<64x128xf32>
    %c0_17 = arith.constant 0 : index
    %c0_18 = arith.constant 0 : index
    %14 = vector.load %arg10[%c0_17, %c0_18] : memref<64x128xf32, #tpu.memory_space<vmem>>, vector<64x128xf32>
    tpu.vector_store %arg10[%c0_17, %c0_18], %13 {strides = array<i32>} : memref<64x128xf32, #tpu.memory_space<vmem>>, vector<64x128xf32>,
    %cst_19 = arith.constant 0.000000e+00 : f32
    %15 = vector.broadcast %cst_19 : f32 to vector<8x32xf32>
    %c0_i32 = arith.constant 0 : i32
    %c8_i32 = arith.constant 8 : i32
    %16 = arith.muli %c0_i32, %c8_i32 : i32
    %17 = tpu.assume_multiple %16, 8 : i32
    %cst_20 = arith.constant dense<0.000000e+00> : vector<8x128xf32>
    %18 = tpu.matmul %15, %0, %cst_20 {dimension_numbers = #tpu.dot_dimension_numbers<[1], [0], [0], [1], [0, 0, 1, 1], [], []>} : vector<8x32xf32>, vector<32x128xf32>, vector<8x128xf32> -> vector<8x128xf32>
    %cst_21 = arith.constant dense<0.000000e+00> : vector<8x128xf32>
    %19 = tpu.matmul %15, %1, %cst_21 {dimension_numbers = #tpu.dot_dimension_numbers<[1], [0], [0], [1], [0, 0, 1, 1], [], []>} : vector<8x32xf32>, vector<32x128xf32>, vector<8x128xf32> -> vector<8x128xf32>
    %20 = arith.index_cast %17 : i32 to index
    %c0_22 = arith.constant 0 : index
    %21 = vector.load %arg10[%20, %c0_22] : memref<64x128xf32, #tpu.memory_space<vmem>>, vector<8x128xf32>
    %22 = arith.addf %21, %18 : vector<8x128xf32>
    %23 = arith.negf %22 : vector<8x128xf32>
    %24 = math.exp %23 : vector<8x128xf32>
    %cst_23 = arith.constant 1.000000e+00 : f32
    %25 = vector.broadcast %cst_23 : f32 to vector<8x128xf32>
    %26 = arith.addf %25, %24 : vector<8x128xf32>
    %27 = arith.divf %25, %26 : vector<8x128xf32>
    %28 = math.tanh %22 : vector<8x128xf32>
    %29 = vector.extract_strided_slice %27 {offsets = [0, 0], sizes = [8, 32], strides = [1, 1]} : vector<8x128xf32> to vector<8x32xf32>
    %30 = vector.extract_strided_slice %27 {offsets = [0, 32], sizes = [8, 32], strides = [1, 1]} : vector<8x128xf32> to vector<8x32xf32>
    %31 = vector.extract_strided_slice %28 {offsets = [0, 64], sizes = [8, 32], strides = [1, 1]} : vector<8x128xf32> to vector<8x32xf32>
    %32 = vector.extract_strided_slice %27 {offsets = [0, 96], sizes = [8, 32], strides = [1, 1]} : vector<8x128xf32> to vector<8x32xf32>
    %33 = arith.mulf %30, %15 : vector<8x32xf32>
    %34 = arith.mulf %29, %31 : vector<8x32xf32>
    %35 = arith.addf %33, %34 : vector<8x32xf32>
    %36 = math.tanh %35 : vector<8x32xf32>
    %37 = arith.mulf %32, %36 : vector<8x32xf32>
    %cst_24 = arith.constant dense<0.000000e+00> : vector<8x128xf32>
    %38 = tpu.matmul %37, %2, %cst_24 {dimension_numbers = #tpu.dot_dimension_numbers<[1], [0], [0], [1], [0, 0, 1, 1], [], []>} : vector<8x32xf32>, vector<32x128xf32>, vector<8x128xf32> -> vector<8x128xf32>
    %39 = arith.addf %38, %19 : vector<8x128xf32>
    %40 = arith.addf %39, %5 : vector<8x128xf32>
    %41 = arith.negf %40 : vector<8x128xf32>
    %42 = math.exp %41 : vector<8x128xf32>
    %cst_25 = arith.constant 1.000000e+00 : f32
    %43 = vector.broadcast %cst_25 : f32 to vector<8x128xf32>
    %44 = arith.addf %43, %42 : vector<8x128xf32>
    %45 = arith.divf %43, %44 : vector<8x128xf32>
    %46 = math.tanh %40 : vector<8x128xf32>
    %47 = vector.extract_strided_slice %45 {offsets = [0, 0], sizes = [8, 32], strides = [1, 1]} : vector<8x128xf32> to vector<8x32xf32>
    %48 = vector.extract_strided_slice %45 {offsets = [0, 32], sizes = [8, 32], strides = [1, 1]} : vector<8x128xf32> to vector<8x32xf32>
    %49 = vector.extract_strided_slice %46 {offsets = [0, 64], sizes = [8, 32], strides = [1, 1]} : vector<8x128xf32> to vector<8x32xf32>
    %50 = vector.extract_strided_slice %45 {offsets = [0, 96], sizes = [8, 32], strides = [1, 1]} : vector<8x128xf32> to vector<8x32xf32>
    %51 = arith.mulf %48, %15 : vector<8x32xf32>
    %52 = arith.mulf %47, %49 : vector<8x32xf32>
    %53 = arith.addf %51, %52 : vector<8x32xf32>
    %54 = math.tanh %53 : vector<8x32xf32>
    %55 = arith.mulf %50, %54 : vector<8x32xf32>
    %56 = arith.index_cast %17 : i32 to index
    %c0_26 = arith.constant 0 : index
    %57 = vector.load %arg11[%56, %c0_26] : memref<64x32xf32, #tpu.memory_space<vmem>>, vector<8x32xf32>
    tpu.vector_store %arg11[%56, %c0_26], %55 {strides = array<i32>} : memref<64x32xf32, #tpu.memory_space<vmem>>, vector<8x32xf32>,
    %c1_i32 = arith.constant 1 : i32
    %c8_i32_27 = arith.constant 8 : i32
    %58 = arith.muli %c1_i32, %c8_i32_27 : i32
    %59 = tpu.assume_multiple %58, 8 : i32
    %cst_28 = arith.constant dense<0.000000e+00> : vector<8x128xf32>
    %60 = tpu.matmul %37, %0, %cst_28 {dimension_numbers = #tpu.dot_dimension_numbers<[1], [0], [0], [1], [0, 0, 1, 1], [], []>} : vector<8x32xf32>, vector<32x128xf32>, vector<8x128xf32> -> vector<8x128xf32>
    %cst_29 = arith.constant dense<0.000000e+00> : vector<8x128xf32>
    %61 = tpu.matmul %55, %1, %cst_29 {dimension_numbers = #tpu.dot_dimension_numbers<[1], [0], [0], [1], [0, 0, 1, 1], [], []>} : vector<8x32xf32>, vector<32x128xf32>, vector<8x128xf32> -> vector<8x128xf32>
    %62 = arith.index_cast %59 : i32 to index
    %c0_30 = arith.constant 0 : index
    %63 = vector.load %arg10[%62, %c0_30] : memref<64x128xf32, #tpu.memory_space<vmem>>, vector<8x128xf32>
    %64 = arith.addf %63, %60 : vector<8x128xf32>
    %65 = arith.negf %64 : vector<8x128xf32>
    %66 = math.exp %65 : vector<8x128xf32>
    %cst_31 = arith.constant 1.000000e+00 : f32
    %67 = vector.broadcast %cst_31 : f32 to vector<8x128xf32>
    %68 = arith.addf %67, %66 : vector<8x128xf32>
    %69 = arith.divf %67, %68 : vector<8x128xf32>
    %70 = math.tanh %64 : vector<8x128xf32>
    %71 = vector.extract_strided_slice %69 {offsets = [0, 0], sizes = [8, 32], strides = [1, 1]} : vector<8x128xf32> to vector<8x32xf32>
    %72 = vector.extract_strided_slice %69 {offsets = [0, 32], sizes = [8, 32], strides = [1, 1]} : vector<8x128xf32> to vector<8x32xf32>
    %73 = vector.extract_strided_slice %70 {offsets = [0, 64], sizes = [8, 32], strides = [1, 1]} : vector<8x128xf32> to vector<8x32xf32>
    %74 = vector.extract_strided_slice %69 {offsets = [0, 96], sizes = [8, 32], strides = [1, 1]} : vector<8x128xf32> to vector<8x32xf32>
    %75 = arith.mulf %72, %35 : vector<8x32xf32>
    %76 = arith.mulf %71, %73 : vector<8x32xf32>
    %77 = arith.addf %75, %76 : vector<8x32xf32>
    %78 = math.tanh %77 : vector<8x32xf32>
    %79 = arith.mulf %74, %78 : vector<8x32xf32>
    %cst_32 = arith.constant dense<0.000000e+00> : vector<8x128xf32>
    %80 = tpu.matmul %79, %2, %cst_32 {dimension_numbers = #tpu.dot_dimension_numbers<[1], [0], [0], [1], [0, 0, 1, 1], [], []>} : vector<8x32xf32>, vector<32x128xf32>, vector<8x128xf32> -> vector<8x128xf32>
    %81 = arith.addf %80, %61 : vector<8x128xf32>
    %82 = arith.addf %81, %5 : vector<8x128xf32>
    %83 = arith.negf %82 : vector<8x128xf32>
    %84 = math.exp %83 : vector<8x128xf32>
    %cst_33 = arith.constant 1.000000e+00 : f32
    %85 = vector.broadcast %cst_33 : f32 to vector<8x128xf32>
    %86 = arith.addf %85, %84 : vector<8x128xf32>
    %87 = arith.divf %85, %86 : vector<8x128xf32>
    %88 = math.tanh %82 : vector<8x128xf32>
    %89 = vector.extract_strided_slice %87 {offsets = [0, 0], sizes = [8, 32], strides = [1, 1]} : vector<8x128xf32> to vector<8x32xf32>
    %90 = vector.extract_strided_slice %87 {offsets = [0, 32], sizes = [8, 32], strides = [1, 1]} : vector<8x128xf32> to vector<8x32xf32>
    %91 = vector.extract_strided_slice %88 {offsets = [0, 64], sizes = [8, 32], strides = [1, 1]} : vector<8x128xf32> to vector<8x32xf32>
    %92 = vector.extract_strided_slice %87 {offsets = [0, 96], sizes = [8, 32], strides = [1, 1]} : vector<8x128xf32> to vector<8x32xf32>
    %93 = arith.mulf %90, %53 : vector<8x32xf32>
    %94 = arith.mulf %89, %91 : vector<8x32xf32>
    %95 = arith.addf %93, %94 : vector<8x32xf32>
    %96 = math.tanh %95 : vector<8x32xf32>
    %97 = arith.mulf %92, %96 : vector<8x32xf32>
    %98 = arith.index_cast %59 : i32 to index
    %c0_34 = arith.constant 0 : index
    %99 = vector.load %arg11[%98, %c0_34] : memref<64x32xf32, #tpu.memory_space<vmem>>, vector<8x32xf32>
    tpu.vector_store %arg11[%98, %c0_34], %97 {strides = array<i32>} : memref<64x32xf32, #tpu.memory_space<vmem>>, vector<8x32xf32>,
    %c2_i32 = arith.constant 2 : i32
    %c8_i32_35 = arith.constant 8 : i32
    %100 = arith.muli %c2_i32, %c8_i32_35 : i32
    %101 = tpu.assume_multiple %100, 8 : i32
    %cst_36 = arith.constant dense<0.000000e+00> : vector<8x128xf32>
    %102 = tpu.matmul %79, %0, %cst_36 {dimension_numbers = #tpu.dot_dimension_numbers<[1], [0], [0], [1], [0, 0, 1, 1], [], []>} : vector<8x32xf32>, vector<32x128xf32>, vector<8x128xf32> -> vector<8x128xf32>
    %cst_37 = arith.constant dense<0.000000e+00> : vector<8x128xf32>
    %103 = tpu.matmul %97, %1, %cst_37 {dimension_numbers = #tpu.dot_dimension_numbers<[1], [0], [0], [1], [0, 0, 1, 1], [], []>} : vector<8x32xf32>, vector<32x128xf32>, vector<8x128xf32> -> vector<8x128xf32>
    %104 = arith.index_cast %101 : i32 to index
    %c0_38 = arith.constant 0 : index
    %105 = vector.load %arg10[%104, %c0_38] : memref<64x128xf32, #tpu.memory_space<vmem>>, vector<8x128xf32>
    %106 = arith.addf %105, %102 : vector<8x128xf32>
    %107 = arith.negf %106 : vector<8x128xf32>
    %108 = math.exp %107 : vector<8x128xf32>
    %cst_39 = arith.constant 1.000000e+00 : f32
    %109 = vector.broadcast %cst_39 : f32 to vector<8x128xf32>
    %110 = arith.addf %109, %108 : vector<8x128xf32>
    %111 = arith.divf %109, %110 : vector<8x128xf32>
    %112 = math.tanh %106 : vector<8x128xf32>
    %113 = vector.extract_strided_slice %111 {offsets = [0, 0], sizes = [8, 32], strides = [1, 1]} : vector<8x128xf32> to vector<8x32xf32>
    %114 = vector.extract_strided_slice %111 {offsets = [0, 32], sizes = [8, 32], strides = [1, 1]} : vector<8x128xf32> to vector<8x32xf32>
    %115 = vector.extract_strided_slice %112 {offsets = [0, 64], sizes = [8, 32], strides = [1, 1]} : vector<8x128xf32> to vector<8x32xf32>
    %116 = vector.extract_strided_slice %111 {offsets = [0, 96], sizes = [8, 32], strides = [1, 1]} : vector<8x128xf32> to vector<8x32xf32>
    %117 = arith.mulf %114, %77 : vector<8x32xf32>
    %118 = arith.mulf %113, %115 : vector<8x32xf32>
    %119 = arith.addf %117, %118 : vector<8x32xf32>
    %120 = math.tanh %119 : vector<8x32xf32>
    %121 = arith.mulf %116, %120 : vector<8x32xf32>
    %cst_40 = arith.constant dense<0.000000e+00> : vector<8x128xf32>
    %122 = tpu.matmul %121, %2, %cst_40 {dimension_numbers = #tpu.dot_dimension_numbers<[1], [0], [0], [1], [0, 0, 1, 1], [], []>} : vector<8x32xf32>, vector<32x128xf32>, vector<8x128xf32> -> vector<8x128xf32>
    %123 = arith.addf %122, %103 : vector<8x128xf32>
    %124 = arith.addf %123, %5 : vector<8x128xf32>
    %125 = arith.negf %124 : vector<8x128xf32>
    %126 = math.exp %125 : vector<8x128xf32>
    %cst_41 = arith.constant 1.000000e+00 : f32
    %127 = vector.broadcast %cst_41 : f32 to vector<8x128xf32>
    %128 = arith.addf %127, %126 : vector<8x128xf32>
    %129 = arith.divf %127, %128 : vector<8x128xf32>
    %130 = math.tanh %124 : vector<8x128xf32>
    %131 = vector.extract_strided_slice %129 {offsets = [0, 0], sizes = [8, 32], strides = [1, 1]} : vector<8x128xf32> to vector<8x32xf32>
    %132 = vector.extract_strided_slice %129 {offsets = [0, 32], sizes = [8, 32], strides = [1, 1]} : vector<8x128xf32> to vector<8x32xf32>
    %133 = vector.extract_strided_slice %130 {offsets = [0, 64], sizes = [8, 32], strides = [1, 1]} : vector<8x128xf32> to vector<8x32xf32>
    %134 = vector.extract_strided_slice %129 {offsets = [0, 96], sizes = [8, 32], strides = [1, 1]} : vector<8x128xf32> to vector<8x32xf32>
    %135 = arith.mulf %132, %95 : vector<8x32xf32>
    %136 = arith.mulf %131, %133 : vector<8x32xf32>
    %137 = arith.addf %135, %136 : vector<8x32xf32>
    %138 = math.tanh %137 : vector<8x32xf32>
    %139 = arith.mulf %134, %138 : vector<8x32xf32>
    %140 = arith.index_cast %101 : i32 to index
    %c0_42 = arith.constant 0 : index
    %141 = vector.load %arg11[%140, %c0_42] : memref<64x32xf32, #tpu.memory_space<vmem>>, vector<8x32xf32>
    tpu.vector_store %arg11[%140, %c0_42], %139 {strides = array<i32>} : memref<64x32xf32, #tpu.memory_space<vmem>>, vector<8x32xf32>,
    %c3_i32 = arith.constant 3 : i32
    %c8_i32_43 = arith.constant 8 : i32
    %142 = arith.muli %c3_i32, %c8_i32_43 : i32
    %143 = tpu.assume_multiple %142, 8 : i32
    %cst_44 = arith.constant dense<0.000000e+00> : vector<8x128xf32>
    %144 = tpu.matmul %121, %0, %cst_44 {dimension_numbers = #tpu.dot_dimension_numbers<[1], [0], [0], [1], [0, 0, 1, 1], [], []>} : vector<8x32xf32>, vector<32x128xf32>, vector<8x128xf32> -> vector<8x128xf32>
    %cst_45 = arith.constant dense<0.000000e+00> : vector<8x128xf32>
    %145 = tpu.matmul %139, %1, %cst_45 {dimension_numbers = #tpu.dot_dimension_numbers<[1], [0], [0], [1], [0, 0, 1, 1], [], []>} : vector<8x32xf32>, vector<32x128xf32>, vector<8x128xf32> -> vector<8x128xf32>
    %146 = arith.index_cast %143 : i32 to index
    %c0_46 = arith.constant 0 : index
    %147 = vector.load %arg10[%146, %c0_46] : memref<64x128xf32, #tpu.memory_space<vmem>>, vector<8x128xf32>
    %148 = arith.addf %147, %144 : vector<8x128xf32>
    %149 = arith.negf %148 : vector<8x128xf32>
    %150 = math.exp %149 : vector<8x128xf32>
    %cst_47 = arith.constant 1.000000e+00 : f32
    %151 = vector.broadcast %cst_47 : f32 to vector<8x128xf32>
    %152 = arith.addf %151, %150 : vector<8x128xf32>
    %153 = arith.divf %151, %152 : vector<8x128xf32>
    %154 = math.tanh %148 : vector<8x128xf32>
    %155 = vector.extract_strided_slice %153 {offsets = [0, 0], sizes = [8, 32], strides = [1, 1]} : vector<8x128xf32> to vector<8x32xf32>
    %156 = vector.extract_strided_slice %153 {offsets = [0, 32], sizes = [8, 32], strides = [1, 1]} : vector<8x128xf32> to vector<8x32xf32>
    %157 = vector.extract_strided_slice %154 {offsets = [0, 64], sizes = [8, 32], strides = [1, 1]} : vector<8x128xf32> to vector<8x32xf32>
    %158 = vector.extract_strided_slice %153 {offsets = [0, 96], sizes = [8, 32], strides = [1, 1]} : vector<8x128xf32> to vector<8x32xf32>
    %159 = arith.mulf %156, %119 : vector<8x32xf32>
    %160 = arith.mulf %155, %157 : vector<8x32xf32>
    %161 = arith.addf %159, %160 : vector<8x32xf32>
    %162 = math.tanh %161 : vector<8x32xf32>
    %163 = arith.mulf %158, %162 : vector<8x32xf32>
    %cst_48 = arith.constant dense<0.000000e+00> : vector<8x128xf32>
    %164 = tpu.matmul %163, %2, %cst_48 {dimension_numbers = #tpu.dot_dimension_numbers<[1], [0], [0], [1], [0, 0, 1, 1], [], []>} : vector<8x32xf32>, vector<32x128xf32>, vector<8x128xf32> -> vector<8x128xf32>
    %165 = arith.addf %164, %145 : vector<8x128xf32>
    %166 = arith.addf %165, %5 : vector<8x128xf32>
    %167 = arith.negf %166 : vector<8x128xf32>
    %168 = math.exp %167 : vector<8x128xf32>
    %cst_49 = arith.constant 1.000000e+00 : f32
    %169 = vector.broadcast %cst_49 : f32 to vector<8x128xf32>
    %170 = arith.addf %169, %168 : vector<8x128xf32>
    %171 = arith.divf %169, %170 : vector<8x128xf32>
    %172 = math.tanh %166 : vector<8x128xf32>
    %173 = vector.extract_strided_slice %171 {offsets = [0, 0], sizes = [8, 32], strides = [1, 1]} : vector<8x128xf32> to vector<8x32xf32>
    %174 = vector.extract_strided_slice %171 {offsets = [0, 32], sizes = [8, 32], strides = [1, 1]} : vector<8x128xf32> to vector<8x32xf32>
    %175 = vector.extract_strided_slice %172 {offsets = [0, 64], sizes = [8, 32], strides = [1, 1]} : vector<8x128xf32> to vector<8x32xf32>
    %176 = vector.extract_strided_slice %171 {offsets = [0, 96], sizes = [8, 32], strides = [1, 1]} : vector<8x128xf32> to vector<8x32xf32>
    %177 = arith.mulf %174, %137 : vector<8x32xf32>
    %178 = arith.mulf %173, %175 : vector<8x32xf32>
    %179 = arith.addf %177, %178 : vector<8x32xf32>
    %180 = math.tanh %179 : vector<8x32xf32>
    %181 = arith.mulf %176, %180 : vector<8x32xf32>
    %182 = arith.index_cast %143 : i32 to index
    %c0_50 = arith.constant 0 : index
    %183 = vector.load %arg11[%182, %c0_50] : memref<64x32xf32, #tpu.memory_space<vmem>>, vector<8x32xf32>
    tpu.vector_store %arg11[%182, %c0_50], %181 {strides = array<i32>} : memref<64x32xf32, #tpu.memory_space<vmem>>, vector<8x32xf32>,
    %c4_i32 = arith.constant 4 : i32
    %c8_i32_51 = arith.constant 8 : i32
    %184 = arith.muli %c4_i32, %c8_i32_51 : i32
    %185 = tpu.assume_multiple %184, 8 : i32
    %cst_52 = arith.constant dense<0.000000e+00> : vector<8x128xf32>
    %186 = tpu.matmul %163, %0, %cst_52 {dimension_numbers = #tpu.dot_dimension_numbers<[1], [0], [0], [1], [0, 0, 1, 1], [], []>} : vector<8x32xf32>, vector<32x128xf32>, vector<8x128xf32> -> vector<8x128xf32>
    %cst_53 = arith.constant dense<0.000000e+00> : vector<8x128xf32>
    %187 = tpu.matmul %181, %1, %cst_53 {dimension_numbers = #tpu.dot_dimension_numbers<[1], [0], [0], [1], [0, 0, 1, 1], [], []>} : vector<8x32xf32>, vector<32x128xf32>, vector<8x128xf32> -> vector<8x128xf32>
    %188 = arith.index_cast %185 : i32 to index
    %c0_54 = arith.constant 0 : index
    %189 = vector.load %arg10[%188, %c0_54] : memref<64x128xf32, #tpu.memory_space<vmem>>, vector<8x128xf32>
    %190 = arith.addf %189, %186 : vector<8x128xf32>
    %191 = arith.negf %190 : vector<8x128xf32>
    %192 = math.exp %191 : vector<8x128xf32>
    %cst_55 = arith.constant 1.000000e+00 : f32
    %193 = vector.broadcast %cst_55 : f32 to vector<8x128xf32>
    %194 = arith.addf %193, %192 : vector<8x128xf32>
    %195 = arith.divf %193, %194 : vector<8x128xf32>
    %196 = math.tanh %190 : vector<8x128xf32>
    %197 = vector.extract_strided_slice %195 {offsets = [0, 0], sizes = [8, 32], strides = [1, 1]} : vector<8x128xf32> to vector<8x32xf32>
    %198 = vector.extract_strided_slice %195 {offsets = [0, 32], sizes = [8, 32], strides = [1, 1]} : vector<8x128xf32> to vector<8x32xf32>
    %199 = vector.extract_strided_slice %196 {offsets = [0, 64], sizes = [8, 32], strides = [1, 1]} : vector<8x128xf32> to vector<8x32xf32>
    %200 = vector.extract_strided_slice %195 {offsets = [0, 96], sizes = [8, 32], strides = [1, 1]} : vector<8x128xf32> to vector<8x32xf32>
    %201 = arith.mulf %198, %161 : vector<8x32xf32>
    %202 = arith.mulf %197, %199 : vector<8x32xf32>
    %203 = arith.addf %201, %202 : vector<8x32xf32>
    %204 = math.tanh %203 : vector<8x32xf32>
    %205 = arith.mulf %200, %204 : vector<8x32xf32>
    %cst_56 = arith.constant dense<0.000000e+00> : vector<8x128xf32>
    %206 = tpu.matmul %205, %2, %cst_56 {dimension_numbers = #tpu.dot_dimension_numbers<[1], [0], [0], [1], [0, 0, 1, 1], [], []>} : vector<8x32xf32>, vector<32x128xf32>, vector<8x128xf32> -> vector<8x128xf32>
    %207 = arith.addf %206, %187 : vector<8x128xf32>
    %208 = arith.addf %207, %5 : vector<8x128xf32>
    %209 = arith.negf %208 : vector<8x128xf32>
    %210 = math.exp %209 : vector<8x128xf32>
    %cst_57 = arith.constant 1.000000e+00 : f32
    %211 = vector.broadcast %cst_57 : f32 to vector<8x128xf32>
    %212 = arith.addf %211, %210 : vector<8x128xf32>
    %213 = arith.divf %211, %212 : vector<8x128xf32>
    %214 = math.tanh %208 : vector<8x128xf32>
    %215 = vector.extract_strided_slice %213 {offsets = [0, 0], sizes = [8, 32], strides = [1, 1]} : vector<8x128xf32> to vector<8x32xf32>
    %216 = vector.extract_strided_slice %213 {offsets = [0, 32], sizes = [8, 32], strides = [1, 1]} : vector<8x128xf32> to vector<8x32xf32>
    %217 = vector.extract_strided_slice %214 {offsets = [0, 64], sizes = [8, 32], strides = [1, 1]} : vector<8x128xf32> to vector<8x32xf32>
    %218 = vector.extract_strided_slice %213 {offsets = [0, 96], sizes = [8, 32], strides = [1, 1]} : vector<8x128xf32> to vector<8x32xf32>
    %219 = arith.mulf %216, %179 : vector<8x32xf32>
    %220 = arith.mulf %215, %217 : vector<8x32xf32>
    %221 = arith.addf %219, %220 : vector<8x32xf32>
    %222 = math.tanh %221 : vector<8x32xf32>
    %223 = arith.mulf %218, %222 : vector<8x32xf32>
    %224 = arith.index_cast %185 : i32 to index
    %c0_58 = arith.constant 0 : index
    %225 = vector.load %arg11[%224, %c0_58] : memref<64x32xf32, #tpu.memory_space<vmem>>, vector<8x32xf32>
    tpu.vector_store %arg11[%224, %c0_58], %223 {strides = array<i32>} : memref<64x32xf32, #tpu.memory_space<vmem>>, vector<8x32xf32>,
    %c5_i32 = arith.constant 5 : i32
    %c8_i32_59 = arith.constant 8 : i32
    %226 = arith.muli %c5_i32, %c8_i32_59 : i32
    %227 = tpu.assume_multiple %226, 8 : i32
    %cst_60 = arith.constant dense<0.000000e+00> : vector<8x128xf32>
    %228 = tpu.matmul %205, %0, %cst_60 {dimension_numbers = #tpu.dot_dimension_numbers<[1], [0], [0], [1], [0, 0, 1, 1], [], []>} : vector<8x32xf32>, vector<32x128xf32>, vector<8x128xf32> -> vector<8x128xf32>
    %cst_61 = arith.constant dense<0.000000e+00> : vector<8x128xf32>
    %229 = tpu.matmul %223, %1, %cst_61 {dimension_numbers = #tpu.dot_dimension_numbers<[1], [0], [0], [1], [0, 0, 1, 1], [], []>} : vector<8x32xf32>, vector<32x128xf32>, vector<8x128xf32> -> vector<8x128xf32>
    %230 = arith.index_cast %227 : i32 to index
    %c0_62 = arith.constant 0 : index
    %231 = vector.load %arg10[%230, %c0_62] : memref<64x128xf32, #tpu.memory_space<vmem>>, vector<8x128xf32>
    %232 = arith.addf %231, %228 : vector<8x128xf32>
    %233 = arith.negf %232 : vector<8x128xf32>
    %234 = math.exp %233 : vector<8x128xf32>
    %cst_63 = arith.constant 1.000000e+00 : f32
    %235 = vector.broadcast %cst_63 : f32 to vector<8x128xf32>
    %236 = arith.addf %235, %234 : vector<8x128xf32>
    %237 = arith.divf %235, %236 : vector<8x128xf32>
    %238 = math.tanh %232 : vector<8x128xf32>
    %239 = vector.extract_strided_slice %237 {offsets = [0, 0], sizes = [8, 32], strides = [1, 1]} : vector<8x128xf32> to vector<8x32xf32>
    %240 = vector.extract_strided_slice %237 {offsets = [0, 32], sizes = [8, 32], strides = [1, 1]} : vector<8x128xf32> to vector<8x32xf32>
    %241 = vector.extract_strided_slice %238 {offsets = [0, 64], sizes = [8, 32], strides = [1, 1]} : vector<8x128xf32> to vector<8x32xf32>
    %242 = vector.extract_strided_slice %237 {offsets = [0, 96], sizes = [8, 32], strides = [1, 1]} : vector<8x128xf32> to vector<8x32xf32>
    %243 = arith.mulf %240, %203 : vector<8x32xf32>
    %244 = arith.mulf %239, %241 : vector<8x32xf32>
    %245 = arith.addf %243, %244 : vector<8x32xf32>
    %246 = math.tanh %245 : vector<8x32xf32>
    %247 = arith.mulf %242, %246 : vector<8x32xf32>
    %cst_64 = arith.constant dense<0.000000e+00> : vector<8x128xf32>
    %248 = tpu.matmul %247, %2, %cst_64 {dimension_numbers = #tpu.dot_dimension_numbers<[1], [0], [0], [1], [0, 0, 1, 1], [], []>} : vector<8x32xf32>, vector<32x128xf32>, vector<8x128xf32> -> vector<8x128xf32>
    %249 = arith.addf %248, %229 : vector<8x128xf32>
    %250 = arith.addf %249, %5 : vector<8x128xf32>
    %251 = arith.negf %250 : vector<8x128xf32>
    %252 = math.exp %251 : vector<8x128xf32>
    %cst_65 = arith.constant 1.000000e+00 : f32
    %253 = vector.broadcast %cst_65 : f32 to vector<8x128xf32>
    %254 = arith.addf %253, %252 : vector<8x128xf32>
    %255 = arith.divf %253, %254 : vector<8x128xf32>
    %256 = math.tanh %250 : vector<8x128xf32>
    %257 = vector.extract_strided_slice %255 {offsets = [0, 0], sizes = [8, 32], strides = [1, 1]} : vector<8x128xf32> to vector<8x32xf32>
    %258 = vector.extract_strided_slice %255 {offsets = [0, 32], sizes = [8, 32], strides = [1, 1]} : vector<8x128xf32> to vector<8x32xf32>
    %259 = vector.extract_strided_slice %256 {offsets = [0, 64], sizes = [8, 32], strides = [1, 1]} : vector<8x128xf32> to vector<8x32xf32>
    %260 = vector.extract_strided_slice %255 {offsets = [0, 96], sizes = [8, 32], strides = [1, 1]} : vector<8x128xf32> to vector<8x32xf32>
    %261 = arith.mulf %258, %221 : vector<8x32xf32>
    %262 = arith.mulf %257, %259 : vector<8x32xf32>
    %263 = arith.addf %261, %262 : vector<8x32xf32>
    %264 = math.tanh %263 : vector<8x32xf32>
    %265 = arith.mulf %260, %264 : vector<8x32xf32>
    %266 = arith.index_cast %227 : i32 to index
    %c0_66 = arith.constant 0 : index
    %267 = vector.load %arg11[%266, %c0_66] : memref<64x32xf32, #tpu.memory_space<vmem>>, vector<8x32xf32>
    tpu.vector_store %arg11[%266, %c0_66], %265 {strides = array<i32>} : memref<64x32xf32, #tpu.memory_space<vmem>>, vector<8x32xf32>,
    %c6_i32 = arith.constant 6 : i32
    %c8_i32_67 = arith.constant 8 : i32
    %268 = arith.muli %c6_i32, %c8_i32_67 : i32
    %269 = tpu.assume_multiple %268, 8 : i32
    %cst_68 = arith.constant dense<0.000000e+00> : vector<8x128xf32>
    %270 = tpu.matmul %247, %0, %cst_68 {dimension_numbers = #tpu.dot_dimension_numbers<[1], [0], [0], [1], [0, 0, 1, 1], [], []>} : vector<8x32xf32>, vector<32x128xf32>, vector<8x128xf32> -> vector<8x128xf32>
    %cst_69 = arith.constant dense<0.000000e+00> : vector<8x128xf32>
    %271 = tpu.matmul %265, %1, %cst_69 {dimension_numbers = #tpu.dot_dimension_numbers<[1], [0], [0], [1], [0, 0, 1, 1], [], []>} : vector<8x32xf32>, vector<32x128xf32>, vector<8x128xf32> -> vector<8x128xf32>
    %272 = arith.index_cast %269 : i32 to index
    %c0_70 = arith.constant 0 : index
    %273 = vector.load %arg10[%272, %c0_70] : memref<64x128xf32, #tpu.memory_space<vmem>>, vector<8x128xf32>
    %274 = arith.addf %273, %270 : vector<8x128xf32>
    %275 = arith.negf %274 : vector<8x128xf32>
    %276 = math.exp %275 : vector<8x128xf32>
    %cst_71 = arith.constant 1.000000e+00 : f32
    %277 = vector.broadcast %cst_71 : f32 to vector<8x128xf32>
    %278 = arith.addf %277, %276 : vector<8x128xf32>
    %279 = arith.divf %277, %278 : vector<8x128xf32>
    %280 = math.tanh %274 : vector<8x128xf32>
    %281 = vector.extract_strided_slice %279 {offsets = [0, 0], sizes = [8, 32], strides = [1, 1]} : vector<8x128xf32> to vector<8x32xf32>
    %282 = vector.extract_strided_slice %279 {offsets = [0, 32], sizes = [8, 32], strides = [1, 1]} : vector<8x128xf32> to vector<8x32xf32>
    %283 = vector.extract_strided_slice %280 {offsets = [0, 64], sizes = [8, 32], strides = [1, 1]} : vector<8x128xf32> to vector<8x32xf32>
    %284 = vector.extract_strided_slice %279 {offsets = [0, 96], sizes = [8, 32], strides = [1, 1]} : vector<8x128xf32> to vector<8x32xf32>
    %285 = arith.mulf %282, %245 : vector<8x32xf32>
    %286 = arith.mulf %281, %283 : vector<8x32xf32>
    %287 = arith.addf %285, %286 : vector<8x32xf32>
    %288 = math.tanh %287 : vector<8x32xf32>
    %289 = arith.mulf %284, %288 : vector<8x32xf32>
    %cst_72 = arith.constant dense<0.000000e+00> : vector<8x128xf32>
    %290 = tpu.matmul %289, %2, %cst_72 {dimension_numbers = #tpu.dot_dimension_numbers<[1], [0], [0], [1], [0, 0, 1, 1], [], []>} : vector<8x32xf32>, vector<32x128xf32>, vector<8x128xf32> -> vector<8x128xf32>
    %291 = arith.addf %290, %271 : vector<8x128xf32>
    %292 = arith.addf %291, %5 : vector<8x128xf32>
    %293 = arith.negf %292 : vector<8x128xf32>
    %294 = math.exp %293 : vector<8x128xf32>
    %cst_73 = arith.constant 1.000000e+00 : f32
    %295 = vector.broadcast %cst_73 : f32 to vector<8x128xf32>
    %296 = arith.addf %295, %294 : vector<8x128xf32>
    %297 = arith.divf %295, %296 : vector<8x128xf32>
    %298 = math.tanh %292 : vector<8x128xf32>
    %299 = vector.extract_strided_slice %297 {offsets = [0, 0], sizes = [8, 32], strides = [1, 1]} : vector<8x128xf32> to vector<8x32xf32>
    %300 = vector.extract_strided_slice %297 {offsets = [0, 32], sizes = [8, 32], strides = [1, 1]} : vector<8x128xf32> to vector<8x32xf32>
    %301 = vector.extract_strided_slice %298 {offsets = [0, 64], sizes = [8, 32], strides = [1, 1]} : vector<8x128xf32> to vector<8x32xf32>
    %302 = vector.extract_strided_slice %297 {offsets = [0, 96], sizes = [8, 32], strides = [1, 1]} : vector<8x128xf32> to vector<8x32xf32>
    %303 = arith.mulf %300, %263 : vector<8x32xf32>
    %304 = arith.mulf %299, %301 : vector<8x32xf32>
    %305 = arith.addf %303, %304 : vector<8x32xf32>
    %306 = math.tanh %305 : vector<8x32xf32>
    %307 = arith.mulf %302, %306 : vector<8x32xf32>
    %308 = arith.index_cast %269 : i32 to index
    %c0_74 = arith.constant 0 : index
    %309 = vector.load %arg11[%308, %c0_74] : memref<64x32xf32, #tpu.memory_space<vmem>>, vector<8x32xf32>
    tpu.vector_store %arg11[%308, %c0_74], %307 {strides = array<i32>} : memref<64x32xf32, #tpu.memory_space<vmem>>, vector<8x32xf32>,
    %c7_i32 = arith.constant 7 : i32
    %c8_i32_75 = arith.constant 8 : i32
    %310 = arith.muli %c7_i32, %c8_i32_75 : i32
    %311 = tpu.assume_multiple %310, 8 : i32
    %cst_76 = arith.constant dense<0.000000e+00> : vector<8x128xf32>
    %312 = tpu.matmul %289, %0, %cst_76 {dimension_numbers = #tpu.dot_dimension_numbers<[1], [0], [0], [1], [0, 0, 1, 1], [], []>} : vector<8x32xf32>, vector<32x128xf32>, vector<8x128xf32> -> vector<8x128xf32>
    %cst_77 = arith.constant dense<0.000000e+00> : vector<8x128xf32>
    %313 = tpu.matmul %307, %1, %cst_77 {dimension_numbers = #tpu.dot_dimension_numbers<[1], [0], [0], [1], [0, 0, 1, 1], [], []>} : vector<8x32xf32>, vector<32x128xf32>, vector<8x128xf32> -> vector<8x128xf32>
    %314 = arith.index_cast %311 : i32 to index
    %c0_78 = arith.constant 0 : index
    %315 = vector.load %arg10[%314, %c0_78] : memref<64x128xf32, #tpu.memory_space<vmem>>, vector<8x128xf32>
    %316 = arith.addf %315, %312 : vector<8x128xf32>
    %317 = arith.negf %316 : vector<8x128xf32>
    %318 = math.exp %317 : vector<8x128xf32>
    %cst_79 = arith.constant 1.000000e+00 : f32
    %319 = vector.broadcast %cst_79 : f32 to vector<8x128xf32>
    %320 = arith.addf %319, %318 : vector<8x128xf32>
    %321 = arith.divf %319, %320 : vector<8x128xf32>
    %322 = math.tanh %316 : vector<8x128xf32>
    %323 = vector.extract_strided_slice %321 {offsets = [0, 0], sizes = [8, 32], strides = [1, 1]} : vector<8x128xf32> to vector<8x32xf32>
    %324 = vector.extract_strided_slice %321 {offsets = [0, 32], sizes = [8, 32], strides = [1, 1]} : vector<8x128xf32> to vector<8x32xf32>
    %325 = vector.extract_strided_slice %322 {offsets = [0, 64], sizes = [8, 32], strides = [1, 1]} : vector<8x128xf32> to vector<8x32xf32>
    %326 = vector.extract_strided_slice %321 {offsets = [0, 96], sizes = [8, 32], strides = [1, 1]} : vector<8x128xf32> to vector<8x32xf32>
    %327 = arith.mulf %324, %287 : vector<8x32xf32>
    %328 = arith.mulf %323, %325 : vector<8x32xf32>
    %329 = arith.addf %327, %328 : vector<8x32xf32>
    %330 = math.tanh %329 : vector<8x32xf32>
    %331 = arith.mulf %326, %330 : vector<8x32xf32>
    %cst_80 = arith.constant dense<0.000000e+00> : vector<8x128xf32>
    %332 = tpu.matmul %331, %2, %cst_80 {dimension_numbers = #tpu.dot_dimension_numbers<[1], [0], [0], [1], [0, 0, 1, 1], [], []>} : vector<8x32xf32>, vector<32x128xf32>, vector<8x128xf32> -> vector<8x128xf32>
    %333 = arith.addf %332, %313 : vector<8x128xf32>
    %334 = arith.addf %333, %5 : vector<8x128xf32>
    %335 = arith.negf %334 : vector<8x128xf32>
    %336 = math.exp %335 : vector<8x128xf32>
    %cst_81 = arith.constant 1.000000e+00 : f32
    %337 = vector.broadcast %cst_81 : f32 to vector<8x128xf32>
    %338 = arith.addf %337, %336 : vector<8x128xf32>
    %339 = arith.divf %337, %338 : vector<8x128xf32>
    %340 = math.tanh %334 : vector<8x128xf32>
    %341 = vector.extract_strided_slice %339 {offsets = [0, 0], sizes = [8, 32], strides = [1, 1]} : vector<8x128xf32> to vector<8x32xf32>
    %342 = vector.extract_strided_slice %339 {offsets = [0, 32], sizes = [8, 32], strides = [1, 1]} : vector<8x128xf32> to vector<8x32xf32>
    %343 = vector.extract_strided_slice %340 {offsets = [0, 64], sizes = [8, 32], strides = [1, 1]} : vector<8x128xf32> to vector<8x32xf32>
    %344 = vector.extract_strided_slice %339 {offsets = [0, 96], sizes = [8, 32], strides = [1, 1]} : vector<8x128xf32> to vector<8x32xf32>
    %345 = arith.mulf %342, %305 : vector<8x32xf32>
    %346 = arith.mulf %341, %343 : vector<8x32xf32>
    %347 = arith.addf %345, %346 : vector<8x32xf32>
    %348 = math.tanh %347 : vector<8x32xf32>
    %349 = arith.mulf %344, %348 : vector<8x32xf32>
    %350 = arith.index_cast %311 : i32 to index
    %c0_82 = arith.constant 0 : index
    %351 = vector.load %arg11[%350, %c0_82] : memref<64x32xf32, #tpu.memory_space<vmem>>, vector<8x32xf32>
    tpu.vector_store %arg11[%350, %c0_82], %349 {strides = array<i32>} : memref<64x32xf32, #tpu.memory_space<vmem>>, vector<8x32xf32>,
    %c8_i32_83 = arith.constant 8 : i32
    %c0_84 = arith.constant 0 : index
    %c0_85 = arith.constant 0 : index
    %352 = vector.load %arg11[%c0_84, %c0_85] : memref<64x32xf32, #tpu.memory_space<vmem>>, vector<64x32xf32>
    %cst_86 = arith.constant dense<0.000000e+00> : vector<64x128xf32>
    %353 = tpu.matmul %352, %6, %cst_86 {dimension_numbers = #tpu.dot_dimension_numbers<[1], [0], [0], [1], [0, 0, 1, 1], [], []>} : vector<64x32xf32>, vector<32x128xf32>, vector<64x128xf32> -> vector<64x128xf32>
    %354 = vector.broadcast %7 : vector<1x128xf32> to vector<64x128xf32>
    %355 = arith.addf %353, %354 : vector<64x128xf32>
    %c0_87 = arith.constant 0 : index
    %c0_88 = arith.constant 0 : index
    %356 = vector.load %arg9[%c0_87, %c0_88] : memref<64x128xf32, #tpu.memory_space<vmem>>, vector<64x128xf32>
    tpu.vector_store %arg9[%c0_87, %c0_88], %355 {strides = array<i32>} : memref<64x128xf32, #tpu.memory_space<vmem>>, vector<64x128xf32>,
    return
  }
}

</mosaic_0001>

<bundles_post_ra>
// kernel: tpu_custom_call.1
= control target key start
LH: loop header
LB: loop body
LE: loop exit
PB: predicated region body
PF: predicated region fallthrough
CT: control target
= control target key end

     0   :  { %14 = vsyncpa [#allocation5], 0  ;;  %s4013_s0 = inlined_call_operand.vmem [shape: f32[64,4], index: 0, kind: input, shape index: {}]   ;;  %s4014_s1 = inlined_call_operand.vmem [shape: f32[4,128], index: 1, kind: input, shape index: {}]   ;;  %s4015_s2 = inlined_call_operand.vmem [shape: f32[32,128], index: 2, kind: input, shape index: {}]   ;;  %s4016_s3 = inlined_call_operand.vmem [shape: f32[1,128], index: 3, kind: input, shape index: {}]   ;;  %s4017_s4 = inlined_call_operand.vmem [shape: f32[32,128], index: 4, kind: input, shape index: {}]   ;;  %s4018_s5 = inlined_call_operand.hbm [shape: f32[32,128], index: 5, kind: input, shape index: {}]   ;;  %s4019_s6 = inlined_call_operand.vmem [shape: f32[1,128], index: 6, kind: input, shape index: {}]   ;;  %s4020_s7 = inlined_call_operand.hbm [shape: f32[32,128], index: 7, kind: input, shape index: {}]   ;;  %s4021_s8 = inlined_call_operand.vmem [shape: f32[1,128], index: 8, kind: input, shape index: {}]   ;;  %s4022_s9 = inlined_call_operand.hbm [shape: f32[64,128], index: 9, kind: output, shape index: {}]  }
   0x1   :  { %15 = vsyncpa [#allocation8], 0 }
   0x2   :  { %16 = vsyncpa [#allocation6], 0  ;;  %s3475_s30 = smov [#allocation4]   ;;  %s3403_s13 = scalar_lea.hbm %s4018_s5, 512 }
   0x3   :  { %s32_s10 = sshll.u32 %s3475_s30, 4  ;;  %p3404_p0 = scmp.ne.s32.totalorder %s4018_s5, %s3403_s13  ;;  %s33_s10 = int_to_ptr.vmem [resolvable:$true] %s32_s10 }
   0x4   :  { %p3407_p1 = scmp.lt.u32.totalorder %s3403_s13, %s4018_s5 }
   0x6   :  { %p3409_p2 = pnand %p3407_p1, %p3404_p0 }
   0x8   :  { %3412 = shalt.err (!%p3409_p2)
}
   0x9   :  { %s3413_s18 = scalar_lea.vmem %s33_s10, 512  ;;  %p3418_p4 = scmp.lt.s32.totalorder %s33_s10, %s33_s10 }
   0xa   :  { %p3414_p3 = scmp.ne.s32.totalorder %s33_s10, %s3413_s18  ;;  %p3419_p5 = scmp.lt.s32.totalorder %s3413_s18, %s3413_s18 }
   0xc   :  { %p3420_p6 = por %p3419_p5, %p3418_p4 }
   0xe   :  { %p3421_p7 = pnand %p3420_p6, %p3414_p3 }
  0x10   :  { %3424 = shalt.err (!%p3421_p7)
}
  0x11   :  { %s3476_s19 = smov 128   ;;  %s3477_s20 = smov 8  }
  0x12   :  { %38 = dma.hbm_to_vmem [thread:$0]  %s4018_s5, 512, %s33_s10, [#allocation5], %s3476_s19, %s3476_s19, %s3477_s20  }
  0x13   :  { %s3478_s23 = smov [#allocation7]   ;;  %s3425_s27 = scalar_lea.hbm %s4020_s7, 512 }
  0x14   :  { %s46_s24 = sshll.u32 %s3478_s23, 4  ;;  %p3426_p8 = scmp.ne.s32.totalorder %s4020_s7, %s3425_s27  ;;  %s47_s24 = int_to_ptr.vmem [resolvable:$true] %s46_s24 }
  0x15   :  { %p3429_p9 = scmp.lt.u32.totalorder %s3425_s27, %s4020_s7 }
  0x17   :  { %p3431_p10 = pnand %p3429_p9, %p3426_p8 }
  0x19   :  { %3434 = shalt.err (!%p3431_p10)
}
  0x1a   :  { %s3435_s12 = scalar_lea.vmem %s47_s24, 512  ;;  %p3440_p12 = scmp.lt.s32.totalorder %s47_s24, %s47_s24 }
  0x1b   :  { %p3436_p11 = scmp.ne.s32.totalorder %s47_s24, %s3435_s12  ;;  %p3441_p13 = scmp.lt.s32.totalorder %s3435_s12, %s3435_s12 }
  0x1d   :  { %p3442_p0 = por %p3441_p13, %p3440_p12 }
  0x1f   :  { %p3443_p1 = pnand %p3442_p0, %p3436_p11 }
  0x21   :  { %3446 = shalt.err (!%p3443_p1)
}
  0x22   :  { %52 = dma.hbm_to_vmem [thread:$0]  %s4020_s7, 512, %s47_s24, [#allocation8], %s3476_s19, %s3476_s19, %s3477_s20  }
  0x23   :  { %3469 = dma.done.wait [#allocation5], 512  }
  0x24   :  { %3470 = vsyncadd [#allocation5], 4294966784 }
  0x25   :  { %3471 = dma.done.wait [#allocation8], 512  }
  0x26   :  { %3472 = vsyncadd [#allocation8], 4294966784  ;;  %vm126_vm0 = vcmask 1043456   ;;  %vm101_vm1 = vcmask 31744   ;;  %v93_v0 = vld [vmem:[%s4014_s1] sm:$0xf] }
  0x27   :  { %v89_v1 = vld [vmem:[%s4013_s0 + $0x20] sm:$0xff]  ;;  %v90_v2 = vld [vmem:[%s4013_s0 + $0x28] sm:$0xff]  ;;  %3261 = vmatprep.subr.msk.mxu1 %vm126_vm0, %v93_v0  ;;  %v91_v5 = vld [vmem:[%s4013_s0 + $0x30] sm:$0xff]  ;;  %2811 = vmatprep.subr.msk.mxu0 %vm126_vm0, %v93_v0  ;;  %v3479_v8 = vmov 0.0|0.0   ;;  %vm3480_vm2 = vmmov 0   ;;  %v3481_v14 = vmov 0.0  }
  0x28   :  { %2819 = vmatprep.mubr.msk.f32.mxu1 %vm101_vm1, %v89_v1  ;;  %v61_v3 = vld [vmem:[%s4015_s2] sm:$0xff]  ;;  %v62_v4 = vld [vmem:[%s4015_s2 + $0x8] sm:$0xff]  ;;  %3262 = vmatpush3.msk.msra.mxu1 %vm126_vm0, %v93_v0  ;;  %v63_v10 = vld [vmem:[%s4015_s2 + $0x10] sm:$0xff]  ;;  %s3482_s14 = smov 64   ;;  %s3483_s15 = smov 32   ;;  %vm243_vm3 = vcmask 261120  }
  0x29   :  { %v3586_v6 = vpack.c.bf16 %v62_v4, %v61_v3  ;;  %v85_v7 = vld [vmem:[%s4013_s0] sm:$0xff]  ;;  %2820 = vmatmul.mubr.msk.f32.vlgmr.msra.gmra.mrb[0].mxu1 %vm101_vm1, %v90_v2  ;;  %3109 = vmatprep.subr.bf16.mxu1 %v3479_v8  ;;  %v86_v9 = vld [vmem:[%s4013_s0 + $0x8] sm:$0xff]  ;;  %v64_v11 = vld [vmem:[%s4015_s2 + $0x18] sm:$0xff] }
  0x2a   :  { %2822 = vmatprep.mubr.msk.f32.mxu1 %vm101_vm1, %v91_v5  ;;  %v92_v12 = vld [vmem:[%s4013_s0 + $0x38] sm:$0xff]  ;;  %v3608_v13 = vpack.c.bf16 %v64_v11, %v63_v10  ;;  %2812 = vmatpush3.msk.msra.mxu0 %vm126_vm0, %v93_v0  ;;  %v3632_v18 = vld [vmem:[%s4016_s3] ss:$0 sm:$0xff]  ;;  %v65_v36 = vld [vmem:[#allocation4] sm:$0xff] }
  0x2b   :  { %3111 = vmatpush3.bf16.msra.mxu1 %v3586_v6  ;;  %2813 = vmatprep.mubr.msk.f32.mxu0 %vm101_vm1, %v85_v7  ;;  %v66_v37 = vld [vmem:[#allocation4 + $0x8] sm:$0xff]  ;;  %v67_v38 = vld [vmem:[#allocation4 + $0x10] sm:$0xff]  ;;  %v68_v40 = vld [vmem:[#allocation4 + $0x18] sm:$0xff] }
  0x2c   :  { %3112 = vmatprep.subr.bf16.mxu1 %v3479_v8  ;;  %2814 = vmatmul.mubr.msk.f32.vlgmr.msra.gmra.mrb[0].mxu0 %vm101_vm1, %v86_v9  ;;  %v3644_v39 = vpack.c.bf16 %v66_v37, %v65_v36  ;;  %v69_v41 = vld [vmem:[%s4017_s4] sm:$0xff]  ;;  %v70_v42 = vld [vmem:[%s4017_s4 + $0x8] sm:$0xff]  ;;  %v87_v44 = vld [vmem:[%s4013_s0 + $0x10] sm:$0xff]  ;;  %v3664_v47 = vpack.c.bf16 %v68_v40, %v67_v38 }
  0x2d   :  { %2823 = vmatmul.mubr.msk.f32.gmra.mrb[2].mxu1 %vm101_vm1, %v92_v12  ;;  %3121 = vmatprep.subr.bf16.mxu0 %v3479_v8  ;;  %v3652_v43 = vpack.c.bf16 %v70_v42, %v69_v41  ;;  %v88_v45 = vld [vmem:[%s4013_s0 + $0x18] sm:$0xff]  ;;  %v71_v46 = vld [vmem:[%s4017_s4 + $0x10] sm:$0xff]  ;;  %v3714_v59 = vld [vmem:[%s4019_s6] ss:$0 sm:$0xff] }
  0x2e   :  { %2833 = vmatprep.mubr.msk.f32.mxu1 %vm3480_vm2, %v3481_v14  ;;  %2816 = vmatprep.mubr.msk.f32.mxu0 %vm101_vm1, %v87_v44  ;;  %v72_v48 = vld [vmem:[%s4017_s4 + $0x18] sm:$0xff] }
  0x2f   :  { %3114 = vmatpush3.bf16.msra.mxu1 %v3608_v13  ;;  %3123 = vmatpush3.bf16.msra.mxu0 %v3652_v43  ;;  %v3672_v49 = vpack.c.bf16 %v72_v48, %v71_v46 }
  0x30   :  { %3115 = vmatprep.subr.bf16.mxu1 %v3479_v8  ;;  %2817 = vmatmul.mubr.msk.f32.gmra.mrb[2].mxu0 %vm101_vm1, %v88_v45 }
  0x31   :  { %3124 = vmatprep.subr.bf16.mxu0 %v3479_v8  ;;  %2855 = vmatprep.mubr.msk.f32.mxu0 %vm3480_vm2, %v3481_v14 }
  0x32   :  { %2834 = vmatmul.mubr.f32.vlgmr.msra.gmra.mrb[4].mxu1 %v3481_v14 }
  0x33   :  { %2844 = vmatprep.mubr.msk.f32.mxu1 %vm3480_vm2, %v3481_v14  ;;  %3117 = vmatpush3.bf16.msra.mxu1 %v3644_v39 }
  0x34   :  { %3118 = vmatprep.subr.bf16.mxu1 %v3479_v8  ;;  %3126 = vmatpush3.bf16.msra.mxu0 %v3672_v49 }
  0x35   :  { %3133 = vmatprep.subr.bf16.mxu0 %v3479_v8 }
  0x37   :  { %3120 = vmatpush3.bf16.msra.mxu1 %v3664_v47 }
  0x38   :  { %3127 = vmatprep.subr.bf16.mxu1 %v3479_v8 }
  0x3a   :  { %2845 = vmatmul.mubr.f32.vlgmr.msra.gmra.mrb[6].mxu1 %v3481_v14 }
  0x3b   :  { %3129 = vmatpush3.bf16.msra.mxu1 %v3586_v6  ;;  %2866 = vmatprep.mubr.msk.f32.mxu1 %vm3480_vm2, %v3481_v14 }
  0x3c   :  { %3130 = vmatprep.subr.bf16.mxu1 %v3479_v8 }
  0x3f   :  { %3132 = vmatpush3.bf16.msra.mxu1 %v3608_v13 }
  0x40   :  { %3139 = vmatprep.subr.bf16.mxu1 %v3479_v8 }
  0xfc   :  { %v3623_v15 = vpop.f32.mrb[0].mxu1 }
  0xfd   :  { %v3625_v16 = vpop.f32.mrb[1].mxu1 }
  0xff   :  { %v3627_v17 = vpop.f32.mrb[0].mxu0 }
 0x100   :  { %v3634_v19 = vpop.f32.mrb[2].mxu1  ;;  %v196_v20 = vpop.f32.mrb[1].mxu0  ;;  %v202_v58 = vadd.f32 %v3627_v17, %v3632_v18 }
 0x101   :  { %v3636_v21 = vpop.f32.mrb[3].mxu1  ;;  %v197_v22 = vadd.f32 %v3632_v18, %v196_v20 }
 0x103   :  { %v3691_v53 = vpop.f32.mrb[2].mxu0 }
 0x104   :  { %v3693_v54 = vpop.f32.mrb[3].mxu0 }
 0x105   :  { %v313_v23 = vpop.f32.mrb[4].mxu1 }
 0x106   :  { %v388_v24 = vadd.f32 %v313_v23, %v197_v22  ;;  %v2835_v25 = vpop.f32.mrb[5].mxu1 }
 0x108   :  { %3273 = vtanh.f32 %v388_v24  ;;  %v2623_v27 = vmul.f32 -1.442695, %v388_v24 }
 0x10a   :  { %3275 = vpow2.f32 %v2623_v27 }
 0x10d   :  { %v383_v55 = vpop.f32.mrb[6].mxu1 }
 0x10e   :  { %v2846_v56 = vpop.f32.mrb[7].mxu1 }
 0x112   :  { %v3274_v26 = vpop.eup %3273 }
 0x113   :  { %398 = vrot.lane.b32.xlu0 %v3274_v26, %s3482_s14 }
 0x114   :  { %v3276_v28 = vpop.eup %3275 }
 0x115   :  { %v392_v29 = vadd.f32 1.0, %v3276_v28 }
 0x117   :  { %3277 = vrcp.f32 %v392_v29 }
 0x121   :  { %v3278_v30 = vpop.eup %3277 }
 0x122   :  { %v396_v33 = vmul.f32 0.0, %v3278_v30 }
 0x185   :  { %v399_v31 = vpop.permute.xlu0 %398 }
 0x186   :  { %v401_v32 = vmul.f32 %v3278_v30, %v399_v31 }
 0x188   :  { %403 = vrot.lane.b32.xlu0 %v401_v32, %s3483_s15 }
 0x1fa   :  { %v404_v34 = vpop.permute.xlu0 %403 }
 0x1fb   :  { %v3641_v35 = vadd.f32 %v404_v34, %v396_v33 }
 0x1fd   :  { %3279 = vtanh.f32 %v3641_v35 }
 0x207   :  { %v3280_v50 = vpop.eup %3279 }
 0x208   :  { %409 = vrot.lane.b32.xlu1 %v3280_v50, %s3482_s14  ;;  %v207_v50 = vadd.f32 %v3632_v18, %v3693_v54 }
 0x27a   :  { %v410_v51 = vpop.permute.xlu1 %409 }
 0x27b   :  { %v412_v52 = vmul.f32 %v3278_v30, %v410_v51 }
 0x27d   :  { %414 = vrot.lane.b32.xlu1 %v412_v52, %s3483_s15 }
 0x2ef   :  { %v415_v57 = vpop.permute.xlu1 %414 }
 0x2f0   :  { %2856 = vmatmul.mubr.msk.f32.vlgmr.msra.gmra.mrb[4].mxu0 %vm243_vm3, %v415_v57  ;;  %2867 = vmatmul.mubr.msk.f32.vlgmr.msra.gmra.mrb[8].mxu1 %vm243_vm3, %v415_v57 }
 0x2f1   :  { %3141 = vmatpush3.bf16.msra.mxu1 %v3652_v43  ;;  %3135 = vmatpush3.bf16.msra.mxu0 %v3644_v39 }
 0x2f2   :  { %3142 = vmatprep.subr.bf16.mxu1 %v3479_v8  ;;  %3136 = vmatprep.subr.bf16.mxu0 %v3479_v8 }
 0x2f3   :  { %2888 = vmatprep.mubr.msk.f32.mxu1 %vm3480_vm2, %v3481_v14  ;;  %2877 = vmatprep.mubr.msk.f32.mxu0 %vm3480_vm2, %v3481_v14 }
 0x2f5   :  { %3144 = vmatpush3.bf16.msra.mxu1 %v3672_v49  ;;  %3138 = vmatpush3.bf16.msra.mxu0 %v3664_v47 }
 0x2f6   :  { %3145 = vmatprep.subr.bf16.mxu0 %v3479_v8  ;;  %3151 = vmatprep.subr.bf16.mxu1 %v3479_v8 }
 0x3c3   :  { %v484_v60 = vpop.f32.mrb[4].mxu0  ;;  %v584_v61 = vpop.f32.mrb[8].mxu1 }
 0x3c4   :  { %v485_v62 = vadd.f32 %v484_v60, %v383_v55  ;;  %v662_v63 = vadd.f32 %v584_v61, %v202_v58  ;;  %v2857_v0 = vpop.f32.mrb[5].mxu0  ;;  %v2868_v1 = vpop.f32.mrb[9].mxu1 }
 0x3c6   :  { %v488_v2 = vadd.f32 %v3714_v59, %v485_v62  ;;  %3281 = vtanh.f32 %v662_v63  ;;  %v2628_v5 = vmul.f32 -1.442695, %v662_v63 }
 0x3c8   :  { %3283 = vtanh.f32 %v488_v2  ;;  %v2625_v7 = vmul.f32 -1.442695, %v488_v2 }
 0x3c9   :  { %3285 = vpow2.f32 %v2628_v5 }
 0x3ca   :  { %3287 = vpow2.f32 %v2625_v7 }
 0x3d0   :  { %v3282_v3 = vpop.eup %3281 }
 0x3d1   :  { %672 = vrot.lane.b32.xlu1 %v3282_v3, %s3482_s14 }
 0x3d2   :  { %v3284_v4 = vpop.eup %3283 }
 0x3d3   :  { %498 = vrot.lane.b32.xlu0 %v3284_v4, %s3482_s14  ;;  %v3286_v9 = vpop.eup %3285 }
 0x3d4   :  { %v3288_v10 = vpop.eup %3287  ;;  %v666_v11 = vadd.f32 1.0, %v3286_v9 }
 0x3d5   :  { %v492_v12 = vadd.f32 1.0, %v3288_v10 }
 0x3d6   :  { %3289 = vrcp.f32 %v666_v11 }
 0x3d7   :  { %3291 = vrcp.f32 %v492_v12 }
 0x3e0   :  { %v3290_v17 = vpop.eup %3289 }
 0x3e1   :  { %v3292_v23 = vpop.eup %3291  ;;  %v670_v26 = vmul.f32 %v3290_v17, %v3641_v35 }
 0x3e2   :  { %v496_v29 = vmul.f32 0.0, %v3292_v23 }
 0x443   :  { %v673_v20 = vpop.permute.xlu1 %672 }
 0x444   :  { %v675_v22 = vmul.f32 %v3290_v17, %v673_v20 }
 0x445   :  { %v499_v24 = vpop.permute.xlu0 %498 }
 0x446   :  { %v501_v25 = vmul.f32 %v3292_v23, %v499_v24  ;;  %677 = vrot.lane.b32.xlu1 %v675_v22, %s3483_s15 }
 0x448   :  { %503 = vrot.lane.b32.xlu0 %v501_v25, %s3483_s15 }
 0x4b8   :  { %v678_v27 = vpop.permute.xlu1 %677 }
 0x4b9   :  { %v3722_v28 = vadd.f32 %v678_v27, %v670_v26 }
 0x4ba   :  { %v504_v30 = vpop.permute.xlu0 %503 }
 0x4bb   :  { %3293 = vtanh.f32 %v3722_v28  ;;  %v3725_v31 = vadd.f32 %v504_v30, %v496_v29 }
 0x4bd   :  { %3295 = vtanh.f32 %v3725_v31 }
 0x4c5   :  { %v3294_v32 = vpop.eup %3293 }
 0x4c6   :  { %683 = vrot.lane.b32.xlu1 %v3294_v32, %s3482_s14  ;;  %v212_v32 = vadd.f32 %v3691_v53, %v3632_v18 }
 0x4c7   :  { %v3296_v33 = vpop.eup %3295 }
 0x4c8   :  { %509 = vrot.lane.b32.xlu0 %v3296_v33, %s3482_s14 }
 0x538   :  { %v684_v34 = vpop.permute.xlu1 %683 }
 0x539   :  { %v686_v36 = vmul.f32 %v3290_v17, %v684_v34 }
 0x53a   :  { %v510_v35 = vpop.permute.xlu0 %509 }
 0x53b   :  { %v512_v37 = vmul.f32 %v3292_v23, %v510_v35  ;;  %688 = vrot.lane.b32.xlu1 %v686_v36, %s3483_s15 }
 0x53d   :  { %514 = vrot.lane.b32.xlu0 %v512_v37, %s3483_s15 }
 0x5ad   :  { %v689_v38 = vpop.permute.xlu1 %688 }
 0x5ae   :  { %2889 = vmatmul.mubr.msk.f32.vlgmr.msra.gmra.mrb[10].mxu1 %vm243_vm3, %v689_v38 }
 0x5af   :  { %v515_v40 = vpop.permute.xlu0 %514  ;;  %3153 = vmatpush3.bf16.msra.mxu1 %v3644_v39  ;;  %2910 = vmatprep.mubr.msk.f32.mxu1 %vm3480_vm2, %v3481_v14 }
 0x5b0   :  { %517 = vst.msk [vmem:[#allocation3] sm:$0xff] %vm243_vm3, %v515_v40  ;;  %2878 = vmatmul.mubr.msk.f32.vlgmr.msra.gmra.mrb[6].mxu0 %vm243_vm3, %v515_v40  ;;  %3154 = vmatprep.subr.bf16.mxu1 %v3479_v8 }
 0x5b1   :  { %3147 = vmatpush3.bf16.msra.mxu0 %v3586_v6  ;;  %2899 = vmatprep.mubr.msk.f32.mxu0 %vm3480_vm2, %v3481_v14 }
 0x5b2   :  { %3148 = vmatprep.subr.bf16.mxu0 %v3479_v8 }
 0x5b3   :  { %3156 = vmatpush3.bf16.msra.mxu1 %v3664_v47 }
 0x5b4   :  { %3163 = vmatprep.subr.bf16.mxu1 %v3479_v8 }
 0x5b5   :  { %3150 = vmatpush3.bf16.msra.mxu0 %v3608_v13 }
 0x5b6   :  { %3157 = vmatprep.subr.bf16.mxu0 %v3479_v8 }
 0x5b8   :  { %2900 = vmatmul.mubr.msk.f32.vlgmr.msra.gmra.mrb[8].mxu0 %vm243_vm3, %v689_v38 }
 0x5b9   :  { %3159 = vmatpush3.bf16.msra.mxu0 %v3652_v43  ;;  %2921 = vmatprep.mubr.msk.f32.mxu0 %vm3480_vm2, %v3481_v14 }
 0x5ba   :  { %3160 = vmatprep.subr.bf16.mxu0 %v3479_v8 }
 0x5bd   :  { %3162 = vmatpush3.bf16.msra.mxu0 %v3672_v49 }
 0x5be   :  { %3169 = vmatprep.subr.bf16.mxu0 %v3479_v8 }
 0x681   :  { %v758_v41 = vpop.f32.mrb[10].mxu1 }
 0x682   :  { %v2890_v42 = vpop.f32.mrb[11].mxu1 }
 0x683   :  { %v656_v44 = vpop.f32.mrb[6].mxu0 }
 0x684   :  { %v759_v45 = vadd.f32 %v758_v41, %v656_v44  ;;  %v2879_v46 = vpop.f32.mrb[7].mxu0 }
 0x686   :  { %v762_v48 = vadd.f32 %v3714_v59, %v759_v45 }
 0x688   :  { %3297 = vtanh.f32 %v762_v48  ;;  %v2630_v58 = vmul.f32 -1.442695, %v762_v48 }
 0x68b   :  { %v859_v51 = vpop.f32.mrb[8].mxu0 }
 0x68c   :  { %v937_v52 = vadd.f32 %v859_v51, %v207_v50  ;;  %v2901_v55 = vpop.f32.mrb[9].mxu0 }
 0x68e   :  { %3299 = vtanh.f32 %v937_v52  ;;  %v2633_v60 = vmul.f32 -1.442695, %v937_v52 }
 0x68f   :  { %3301 = vpow2.f32 %v2630_v58 }
 0x690   :  { %3303 = vpow2.f32 %v2633_v60 }
 0x692   :  { %v3298_v56 = vpop.eup %3297 }
 0x693   :  { %772 = vrot.lane.b32.xlu0 %v3298_v56, %s3482_s14 }
 0x698   :  { %v3300_v57 = vpop.eup %3299 }
 0x699   :  { %947 = vrot.lane.b32.xlu1 %v3300_v57, %s3482_s14  ;;  %v3302_v61 = vpop.eup %3301 }
 0x69a   :  { %v766_v62 = vadd.f32 1.0, %v3302_v61  ;;  %v3304_v63 = vpop.eup %3303 }
 0x69b   :  { %v941_v0 = vadd.f32 1.0, %v3304_v63 }
 0x69c   :  { %3305 = vrcp.f32 %v766_v62 }
 0x69d   :  { %3307 = vrcp.f32 %v941_v0 }
 0x6a6   :  { %v3306_v54 = vpop.eup %3305 }
 0x6a7   :  { %v3308_v3 = vpop.eup %3307  ;;  %v770_v7 = vmul.f32 %v3306_v54, %v3725_v31 }
 0x6a8   :  { %v945_v11 = vmul.f32 %v3308_v3, %v3722_v28 }
 0x705   :  { %v773_v1 = vpop.permute.xlu0 %772 }
 0x706   :  { %v775_v2 = vmul.f32 %v3306_v54, %v773_v1 }
 0x708   :  { %777 = vrot.lane.b32.xlu0 %v775_v2, %s3483_s15 }
 0x70b   :  { %v948_v4 = vpop.permute.xlu1 %947 }
 0x70c   :  { %v950_v5 = vmul.f32 %v3308_v3, %v948_v4 }
 0x70e   :  { %952 = vrot.lane.b32.xlu1 %v950_v5, %s3483_s15 }
 0x77a   :  { %v778_v9 = vpop.permute.xlu0 %777 }
 0x77b   :  { %v3762_v10 = vadd.f32 %v778_v9, %v770_v7 }
 0x77d   :  { %3309 = vtanh.f32 %v3762_v10 }
 0x780   :  { %v953_v12 = vpop.permute.xlu1 %952 }
 0x781   :  { %v3766_v17 = vadd.f32 %v953_v12, %v945_v11 }
 0x783   :  { %3311 = vtanh.f32 %v3766_v17 }
 0x787   :  { %v3310_v20 = vpop.eup %3309 }
 0x788   :  { %783 = vrot.lane.b32.xlu0 %v3310_v20, %s3482_s14 }
 0x78d   :  { %v3312_v22 = vpop.eup %3311 }
 0x78e   :  { %958 = vrot.lane.b32.xlu1 %v3312_v22, %s3482_s14 }
 0x7fa   :  { %v784_v23 = vpop.permute.xlu0 %783 }
 0x7fb   :  { %v786_v24 = vmul.f32 %v3306_v54, %v784_v23  ;;  %v217_v23 = vadd.f32 %v3632_v18, %v3625_v16 }
 0x7fd   :  { %788 = vrot.lane.b32.xlu0 %v786_v24, %s3483_s15 }
 0x800   :  { %v959_v25 = vpop.permute.xlu1 %958 }
 0x801   :  { %v961_v26 = vmul.f32 %v3308_v3, %v959_v25 }
 0x803   :  { %963 = vrot.lane.b32.xlu1 %v961_v26, %s3483_s15 }
 0x86f   :  { %v789_v27 = vpop.permute.xlu0 %788 }
 0x870   :  { %792 = vst.msk [vmem:[#allocation3 + $0x8] sm:$0xff] %vm243_vm3, %v789_v27  ;;  %2911 = vmatmul.mubr.msk.f32.vlgmr.msra.gmra.mrb[12].mxu1 %vm243_vm3, %v789_v27 }
 0x871   :  { %3165 = vmatpush3.bf16.msra.mxu1 %v3586_v6  ;;  %2932 = vmatprep.mubr.msk.f32.mxu1 %vm3480_vm2, %v3481_v14 }
 0x872   :  { %3166 = vmatprep.subr.bf16.mxu1 %v3479_v8 }
 0x875   :  { %v964_v28 = vpop.permute.xlu1 %963  ;;  %3168 = vmatpush3.bf16.msra.mxu1 %v3608_v13 }
 0x876   :  { %2922 = vmatmul.mubr.msk.f32.vlgmr.msra.gmra.mrb[10].mxu0 %vm243_vm3, %v964_v28  ;;  %3175 = vmatprep.subr.bf16.mxu1 %v3479_v8 }
 0x877   :  { %3171 = vmatpush3.bf16.msra.mxu0 %v3644_v39  ;;  %2943 = vmatprep.mubr.msk.f32.mxu0 %vm3480_vm2, %v3481_v14 }
 0x878   :  { %2933 = vmatmul.mubr.msk.f32.vlgmr.msra.gmra.mrb[14].mxu1 %vm243_vm3, %v964_v28  ;;  %3172 = vmatprep.subr.bf16.mxu0 %v3479_v8 }
 0x879   :  { %3177 = vmatpush3.bf16.msra.mxu1 %v3652_v43  ;;  %2954 = vmatprep.mubr.msk.f32.mxu1 %vm3480_vm2, %v3481_v14 }
 0x87a   :  { %3178 = vmatprep.subr.bf16.mxu1 %v3479_v8 }
 0x87b   :  { %3174 = vmatpush3.bf16.msra.mxu0 %v3664_v47 }
 0x87c   :  { %3181 = vmatprep.subr.bf16.mxu0 %v3479_v8 }
 0x87d   :  { %3180 = vmatpush3.bf16.msra.mxu1 %v3672_v49 }
 0x87e   :  { %3187 = vmatprep.subr.bf16.mxu1 %v3479_v8 }
 0x943   :  { %v931_v29 = vpop.f32.mrb[12].mxu1 }
 0x944   :  { %v2912_v30 = vpop.f32.mrb[13].mxu1 }
 0x949   :  { %v1033_v31 = vpop.f32.mrb[10].mxu0 }
 0x94a   :  { %v1034_v33 = vadd.f32 %v1033_v31, %v931_v29  ;;  %v2923_v34 = vpop.f32.mrb[11].mxu0 }
 0x94b   :  { %v1134_v36 = vpop.f32.mrb[14].mxu1 }
 0x94c   :  { %v1037_v35 = vadd.f32 %v3714_v59, %v1034_v33  ;;  %v1212_v37 = vadd.f32 %v1134_v36, %v212_v32  ;;  %v2934_v38 = vpop.f32.mrb[15].mxu1 }
 0x94e   :  { %3313 = vtanh.f32 %v1037_v35  ;;  %v2635_v42 = vmul.f32 -1.442695, %v1037_v35  ;;  %v2638_v44 = vmul.f32 -1.442695, %v1212_v37 }
 0x94f   :  { %3315 = vtanh.f32 %v1212_v37 }
 0x950   :  { %3317 = vpow2.f32 %v2635_v42 }
 0x951   :  { %3319 = vpow2.f32 %v2638_v44 }
 0x958   :  { %v3314_v40 = vpop.eup %3313 }
 0x959   :  { %v3316_v41 = vpop.eup %3315  ;;  %1047 = vrot.lane.b32.xlu0 %v3314_v40, %s3482_s14 }
 0x95a   :  { %1222 = vrot.lane.b32.xlu1 %v3316_v41, %s3482_s14  ;;  %v3318_v53 = vpop.eup %3317 }
 0x95b   :  { %v3320_v45 = vpop.eup %3319  ;;  %v1041_v46 = vadd.f32 1.0, %v3318_v53 }
 0x95c   :  { %v1216_v48 = vadd.f32 1.0, %v3320_v45 }
 0x95d   :  { %3321 = vrcp.f32 %v1041_v46 }
 0x95e   :  { %3323 = vrcp.f32 %v1216_v48 }
 0x967   :  { %v3322_v50 = vpop.eup %3321 }
 0x968   :  { %v3324_v52 = vpop.eup %3323  ;;  %v1045_v58 = vmul.f32 %v3322_v50, %v3762_v10 }
 0x969   :  { %v1220_v61 = vmul.f32 %v3324_v52, %v3766_v17 }
 0x9cb   :  { %v1048_v51 = vpop.permute.xlu0 %1047 }
 0x9cc   :  { %v1050_v55 = vmul.f32 %v3322_v50, %v1048_v51  ;;  %v1223_v56 = vpop.permute.xlu1 %1222 }
 0x9cd   :  { %v1225_v57 = vmul.f32 %v3324_v52, %v1223_v56 }
 0x9ce   :  { %1052 = vrot.lane.b32.xlu0 %v1050_v55, %s3483_s15 }
 0x9cf   :  { %1227 = vrot.lane.b32.xlu1 %v1225_v57, %s3483_s15 }
 0xa40   :  { %v1053_v60 = vpop.permute.xlu0 %1052 }
 0xa41   :  { %v3804_v62 = vadd.f32 %v1053_v60, %v1045_v58  ;;  %v1228_v63 = vpop.permute.xlu1 %1227 }
 0xa42   :  { %v3806_v0 = vadd.f32 %v1228_v63, %v1220_v61 }
 0xa43   :  { %3325 = vtanh.f32 %v3804_v62 }
 0xa44   :  { %3327 = vtanh.f32 %v3806_v0 }
 0xa4d   :  { %v3326_v54 = vpop.eup %3325 }
 0xa4e   :  { %v3328_v1 = vpop.eup %3327  ;;  %1058 = vrot.lane.b32.xlu0 %v3326_v54, %s3482_s14  ;;  %v222_v54 = vadd.f32 %v3623_v15, %v3632_v18 }
 0xa4f   :  { %1233 = vrot.lane.b32.xlu1 %v3328_v1, %s3482_s14 }
 0xac0   :  { %v1059_v2 = vpop.permute.xlu0 %1058 }
 0xac1   :  { %v1061_v3 = vmul.f32 %v3322_v50, %v1059_v2  ;;  %v1234_v4 = vpop.permute.xlu1 %1233 }
 0xac2   :  { %v1236_v5 = vmul.f32 %v3324_v52, %v1234_v4 }
 0xac3   :  { %1063 = vrot.lane.b32.xlu0 %v1061_v3, %s3483_s15 }
 0xac4   :  { %1238 = vrot.lane.b32.xlu1 %v1236_v5, %s3483_s15 }
 0xb35   :  { %v1064_v7 = vpop.permute.xlu0 %1063 }
 0xb36   :  { %1067 = vst.msk [vmem:[#allocation3 + $0x10] sm:$0xff] %vm243_vm3, %v1064_v7  ;;  %v1239_v9 = vpop.permute.xlu1 %1238  ;;  %2944 = vmatmul.mubr.msk.f32.vlgmr.msra.gmra.mrb[12].mxu0 %vm243_vm3, %v1064_v7 }
 0xb37   :  { %2955 = vmatmul.mubr.msk.f32.vlgmr.msra.gmra.mrb[16].mxu1 %vm243_vm3, %v1239_v9  ;;  %3183 = vmatpush3.bf16.msra.mxu0 %v3586_v6 }
 0xb38   :  { %3184 = vmatprep.subr.bf16.mxu0 %v3479_v8  ;;  %2965 = vmatprep.mubr.msk.f32.mxu0 %vm3480_vm2, %v3481_v14 }
 0xb39   :  { %3189 = vmatpush3.bf16.msra.mxu1 %v3644_v39  ;;  %2976 = vmatprep.mubr.msk.f32.mxu1 %vm3480_vm2, %v3481_v14 }
 0xb3a   :  { %3190 = vmatprep.subr.bf16.mxu1 %v3479_v8 }
 0xb3b   :  { %3186 = vmatpush3.bf16.msra.mxu0 %v3608_v13 }
 0xb3c   :  { %3193 = vmatprep.subr.bf16.mxu0 %v3479_v8 }
 0xb3d   :  { %3192 = vmatpush3.bf16.msra.mxu1 %v3664_v47 }
 0xb3e   :  { %2966 = vmatmul.mubr.msk.f32.vlgmr.msra.gmra.mrb[14].mxu0 %vm243_vm3, %v1239_v9  ;;  %3199 = vmatprep.subr.bf16.mxu1 %v3479_v8 }
 0xb3f   :  { %3195 = vmatpush3.bf16.msra.mxu0 %v3652_v43  ;;  %2987 = vmatprep.mubr.msk.f32.mxu0 %vm3480_vm2, %v3481_v14 }
 0xb40   :  { %3196 = vmatprep.subr.bf16.mxu0 %v3479_v8 }
 0xb43   :  { %3198 = vmatpush3.bf16.msra.mxu0 %v3672_v49 }
 0xb44   :  { %3205 = vmatprep.subr.bf16.mxu0 %v3479_v8 }
 0xc09   :  { %v1206_v10 = vpop.f32.mrb[12].mxu0 }
 0xc0a   :  { %v1308_v11 = vpop.f32.mrb[16].mxu1  ;;  %v2945_v12 = vpop.f32.mrb[13].mxu0 }
 0xc0b   :  { %v1309_v17 = vadd.f32 %v1308_v11, %v1206_v10  ;;  %v2956_v20 = vpop.f32.mrb[17].mxu1 }
 0xc0d   :  { %v1312_v22 = vadd.f32 %v3714_v59, %v1309_v17 }
 0xc0f   :  { %3329 = vtanh.f32 %v1312_v22  ;;  %v2640_v29 = vmul.f32 -1.442695, %v1312_v22 }
 0xc11   :  { %v1409_v24 = vpop.f32.mrb[14].mxu0 }
 0xc12   :  { %v1487_v25 = vadd.f32 %v1409_v24, %v217_v23  ;;  %v2967_v26 = vpop.f32.mrb[15].mxu0 }
 0xc14   :  { %3331 = vtanh.f32 %v1487_v25  ;;  %v2643_v30 = vmul.f32 -1.442695, %v1487_v25 }
 0xc15   :  { %3333 = vpow2.f32 %v2640_v29 }
 0xc16   :  { %3335 = vpow2.f32 %v2643_v30 }
 0xc19   :  { %v3330_v27 = vpop.eup %3329 }
 0xc1a   :  { %1322 = vrot.lane.b32.xlu0 %v3330_v27, %s3482_s14 }
 0xc1e   :  { %v3332_v28 = vpop.eup %3331 }
 0xc1f   :  { %1497 = vrot.lane.b32.xlu1 %v3332_v28, %s3482_s14  ;;  %v3334_v31 = vpop.eup %3333 }
 0xc20   :  { %v1316_v32 = vadd.f32 1.0, %v3334_v31  ;;  %v3336_v33 = vpop.eup %3335 }
 0xc21   :  { %v1491_v34 = vadd.f32 1.0, %v3336_v33 }
 0xc22   :  { %3337 = vrcp.f32 %v1316_v32 }
 0xc23   :  { %3339 = vrcp.f32 %v1491_v34 }
 0xc2c   :  { %v3338_v16 = vpop.eup %3337 }
 0xc2d   :  { %v3340_v37 = vpop.eup %3339  ;;  %v1320_v41 = vmul.f32 %v3338_v16, %v3804_v62 }
 0xc2e   :  { %v1495_v53 = vmul.f32 %v3340_v37, %v3806_v0 }
 0xc8c   :  { %v1323_v36 = vpop.permute.xlu0 %1322 }
 0xc8d   :  { %v1325_v35 = vmul.f32 %v3338_v16, %v1323_v36 }
 0xc8f   :  { %1327 = vrot.lane.b32.xlu0 %v1325_v35, %s3483_s15 }
 0xc91   :  { %v1498_v38 = vpop.permute.xlu1 %1497 }
 0xc92   :  { %v1500_v40 = vmul.f32 %v3340_v37, %v1498_v38 }
 0xc94   :  { %1502 = vrot.lane.b32.xlu1 %v1500_v40, %s3483_s15 }
 0xd01   :  { %v1328_v42 = vpop.permute.xlu0 %1327 }
 0xd02   :  { %v3844_v44 = vadd.f32 %v1328_v42, %v1320_v41 }
 0xd04   :  { %3341 = vtanh.f32 %v3844_v44 }
 0xd06   :  { %v1503_v45 = vpop.permute.xlu1 %1502 }
 0xd07   :  { %v3848_v46 = vadd.f32 %v1503_v45, %v1495_v53 }
 0xd09   :  { %3343 = vtanh.f32 %v3848_v46 }
 0xd0e   :  { %v3342_v48 = vpop.eup %3341 }
 0xd0f   :  { %1333 = vrot.lane.b32.xlu0 %v3342_v48, %s3482_s14  ;;  %v227_v48 = vadd.f32 %v3632_v18, %v3636_v21 }
 0xd13   :  { %v3344_v50 = vpop.eup %3343 }
 0xd14   :  { %1508 = vrot.lane.b32.xlu1 %v3344_v50, %s3482_s14 }
 0xd81   :  { %v1334_v51 = vpop.permute.xlu0 %1333 }
 0xd82   :  { %v1336_v52 = vmul.f32 %v3338_v16, %v1334_v51 }
 0xd84   :  { %1338 = vrot.lane.b32.xlu0 %v1336_v52, %s3483_s15 }
 0xd86   :  { %v1509_v55 = vpop.permute.xlu1 %1508 }
 0xd87   :  { %v1511_v56 = vmul.f32 %v3340_v37, %v1509_v55 }
 0xd89   :  { %1513 = vrot.lane.b32.xlu1 %v1511_v56, %s3483_s15 }
 0xdf6   :  { %v1339_v57 = vpop.permute.xlu0 %1338 }
 0xdf7   :  { %1342 = vst.msk [vmem:[#allocation3 + $0x18] sm:$0xff] %vm243_vm3, %v1339_v57  ;;  %2977 = vmatmul.mubr.msk.f32.vlgmr.msra.gmra.mrb[18].mxu1 %vm243_vm3, %v1339_v57 }
 0xdf8   :  { %3201 = vmatpush3.bf16.msra.mxu1 %v3586_v6  ;;  %2998 = vmatprep.mubr.msk.f32.mxu1 %vm3480_vm2, %v3481_v14 }
 0xdf9   :  { %3202 = vmatprep.subr.bf16.mxu1 %v3479_v8 }
 0xdfb   :  { %v1514_v58 = vpop.permute.xlu1 %1513 }
 0xdfc   :  { %3204 = vmatpush3.bf16.msra.mxu1 %v3608_v13  ;;  %2988 = vmatmul.mubr.msk.f32.vlgmr.msra.gmra.mrb[16].mxu0 %vm243_vm3, %v1514_v58 }
 0xdfd   :  { %3207 = vmatpush3.bf16.msra.mxu0 %v3644_v39  ;;  %3211 = vmatprep.subr.bf16.mxu1 %v3479_v8 }
 0xdfe   :  { %3208 = vmatprep.subr.bf16.mxu0 %v3479_v8  ;;  %3009 = vmatprep.mubr.msk.f32.mxu0 %vm3480_vm2, %v3481_v14 }
 0xdff   :  { %2999 = vmatmul.mubr.msk.f32.vlgmr.msra.gmra.mrb[20].mxu1 %vm243_vm3, %v1514_v58 }
 0xe00   :  { %3213 = vmatpush3.bf16.msra.mxu1 %v3652_v43  ;;  %3020 = vmatprep.mubr.msk.f32.mxu1 %vm3480_vm2, %v3481_v14 }
 0xe01   :  { %3210 = vmatpush3.bf16.msra.mxu0 %v3664_v47  ;;  %3214 = vmatprep.subr.bf16.mxu1 %v3479_v8 }
 0xe02   :  { %3217 = vmatprep.subr.bf16.mxu0 %v3479_v8 }
 0xe04   :  { %3216 = vmatpush3.bf16.msra.mxu1 %v3672_v49 }
 0xe05   :  { %3223 = vmatprep.subr.bf16.mxu1 %v3479_v8 }
 0xeca   :  { %v1481_v60 = vpop.f32.mrb[18].mxu1 }
 0xecb   :  { %v2978_v61 = vpop.f32.mrb[19].mxu1 }
 0xecf   :  { %v1583_v62 = vpop.f32.mrb[16].mxu0 }
 0xed0   :  { %v1584_v63 = vadd.f32 %v1583_v62, %v1481_v60  ;;  %v2989_v0 = vpop.f32.mrb[17].mxu0 }
 0xed2   :  { %v1587_v1 = vadd.f32 %v3714_v59, %v1584_v63  ;;  %v1684_v2 = vpop.f32.mrb[20].mxu1 }
 0xed3   :  { %v1762_v3 = vadd.f32 %v1684_v2, %v222_v54  ;;  %v3000_v4 = vpop.f32.mrb[21].mxu1 }
 0xed4   :  { %3345 = vtanh.f32 %v1587_v1  ;;  %v2645_v9 = vmul.f32 -1.442695, %v1587_v1 }
 0xed5   :  { %3347 = vtanh.f32 %v1762_v3  ;;  %v2648_v10 = vmul.f32 -1.442695, %v1762_v3 }
 0xed6   :  { %3349 = vpow2.f32 %v2645_v9 }
 0xed7   :  { %3351 = vpow2.f32 %v2648_v10 }
 0xede   :  { %v3346_v5 = vpop.eup %3345 }
 0xedf   :  { %v3348_v7 = vpop.eup %3347  ;;  %1597 = vrot.lane.b32.xlu0 %v3346_v5, %s3482_s14 }
 0xee0   :  { %1772 = vrot.lane.b32.xlu1 %v3348_v7, %s3482_s14  ;;  %v3350_v11 = vpop.eup %3349 }
 0xee1   :  { %v3352_v12 = vpop.eup %3351  ;;  %v1591_v15 = vadd.f32 1.0, %v3350_v11 }
 0xee2   :  { %v1766_v17 = vadd.f32 1.0, %v3352_v12 }
 0xee3   :  { %3353 = vrcp.f32 %v1591_v15 }
 0xee4   :  { %3355 = vrcp.f32 %v1766_v17 }
 0xeed   :  { %v3354_v20 = vpop.eup %3353 }
 0xeee   :  { %v3356_v23 = vpop.eup %3355  ;;  %v1595_v27 = vmul.f32 %v3354_v20, %v3844_v44 }
 0xeef   :  { %v1770_v29 = vmul.f32 %v3356_v23, %v3848_v46 }
 0xf51   :  { %v1598_v22 = vpop.permute.xlu0 %1597 }
 0xf52   :  { %v1600_v24 = vmul.f32 %v3354_v20, %v1598_v22  ;;  %v1773_v25 = vpop.permute.xlu1 %1772 }
 0xf53   :  { %v1775_v26 = vmul.f32 %v3356_v23, %v1773_v25 }
 0xf54   :  { %1602 = vrot.lane.b32.xlu0 %v1600_v24, %s3483_s15 }
 0xf55   :  { %1777 = vrot.lane.b32.xlu1 %v1775_v26, %s3483_s15 }
 0xfc6   :  { %v1603_v28 = vpop.permute.xlu0 %1602 }
 0xfc7   :  { %v3886_v30 = vadd.f32 %v1603_v28, %v1595_v27  ;;  %v1778_v31 = vpop.permute.xlu1 %1777  ;;  %v3401_v27 = vld [vmem:[%s4016_s3] ss:$0 sm:$0xff] }
 0xfc8   :  { %v3888_v32 = vadd.f32 %v1778_v31, %v1770_v29 }
 0xfc9   :  { %3357 = vtanh.f32 %v3886_v30 }
 0xfca   :  { %3359 = vtanh.f32 %v3888_v32 }
 0xfd3   :  { %v3358_v33 = vpop.eup %3357 }
 0xfd4   :  { %v3360_v34 = vpop.eup %3359  ;;  %1608 = vrot.lane.b32.xlu0 %v3358_v33, %s3482_s14 }
 0xfd5   :  { %1783 = vrot.lane.b32.xlu1 %v3360_v34, %s3482_s14 }
0x1046   :  { %v1609_v16 = vpop.permute.xlu0 %1608 }
0x1047   :  { %v1611_v36 = vmul.f32 %v3354_v20, %v1609_v16  ;;  %v1784_v35 = vpop.permute.xlu1 %1783 }
0x1048   :  { %v1786_v37 = vmul.f32 %v3356_v23, %v1784_v35 }
0x1049   :  { %1613 = vrot.lane.b32.xlu0 %v1611_v36, %s3483_s15 }
0x104a   :  { %1788 = vrot.lane.b32.xlu1 %v1786_v37, %s3483_s15 }
0x10bb   :  { %v1614_v38 = vpop.permute.xlu0 %1613 }
0x10bc   :  { %1617 = vst.msk [vmem:[#allocation3 + $0x20] sm:$0xff] %vm243_vm3, %v1614_v38  ;;  %v1789_v40 = vpop.permute.xlu1 %1788  ;;  %3010 = vmatmul.mubr.msk.f32.vlgmr.msra.gmra.mrb[18].mxu0 %vm243_vm3, %v1614_v38 }
0x10bd   :  { %3021 = vmatmul.mubr.msk.f32.vlgmr.msra.gmra.mrb[22].mxu1 %vm243_vm3, %v1789_v40  ;;  %3219 = vmatpush3.bf16.msra.mxu0 %v3586_v6 }
0x10be   :  { %3220 = vmatprep.subr.bf16.mxu0 %v3479_v8  ;;  %3031 = vmatprep.mubr.msk.f32.mxu0 %vm3480_vm2, %v3481_v14 }
0x10bf   :  { %3225 = vmatpush3.bf16.msra.mxu1 %v3644_v39  ;;  %3042 = vmatprep.mubr.msk.f32.mxu1 %vm3480_vm2, %v3481_v14 }
0x10c0   :  { %3226 = vmatprep.subr.bf16.mxu1 %v3479_v8 }
0x10c1   :  { %3222 = vmatpush3.bf16.msra.mxu0 %v3608_v13 }
0x10c2   :  { %3229 = vmatprep.subr.bf16.mxu0 %v3479_v8 }
0x10c3   :  { %3228 = vmatpush3.bf16.msra.mxu1 %v3664_v47 }
0x10c4   :  { %3032 = vmatmul.mubr.msk.f32.vlgmr.msra.gmra.mrb[20].mxu0 %vm243_vm3, %v1789_v40  ;;  %3235 = vmatprep.subr.bf16.mxu1 %v3479_v8 }
0x10c5   :  { %3231 = vmatpush3.bf16.msra.mxu0 %v3652_v43  ;;  %3053 = vmatprep.mubr.msk.f32.mxu0 %vm3480_vm2, %v3481_v14 }
0x10c6   :  { %3232 = vmatprep.subr.bf16.mxu0 %v3479_v8 }
0x10c9   :  { %3234 = vmatpush3.bf16.msra.mxu0 %v3672_v49 }
0x10ca   :  { %3241 = vmatprep.subr.bf16.mxu0 %v3479_v8 }
0x118f   :  { %v1756_v41 = vpop.f32.mrb[18].mxu0 }
0x1190   :  { %v1858_v42 = vpop.f32.mrb[22].mxu1  ;;  %v3011_v44 = vpop.f32.mrb[19].mxu0 }
0x1191   :  { %v1859_v53 = vadd.f32 %v1858_v42, %v1756_v41  ;;  %v3022_v45 = vpop.f32.mrb[23].mxu1 }
0x1193   :  { %v1862_v46 = vadd.f32 %v3714_v59, %v1859_v53 }
0x1195   :  { %3361 = vtanh.f32 %v1862_v46  ;;  %v2650_v57 = vmul.f32 -1.442695, %v1862_v46  ;;  %v80_v46 = vld [vmem:[#allocation7] sm:$0xff] }
0x1197   :  { %v1959_v50 = vpop.f32.mrb[20].mxu0 }
0x1198   :  { %v2037_v51 = vadd.f32 %v1959_v50, %v227_v48  ;;  %v3033_v52 = vpop.f32.mrb[21].mxu0  ;;  %v81_v48 = vld [vmem:[#allocation7 + $0x8] sm:$0xff] }
0x1199   :  { %v3253_v50 = vpack.c.bf16 %v81_v48, %v80_v46 }
0x119a   :  { %3363 = vtanh.f32 %v2037_v51  ;;  %v2653_v58 = vmul.f32 -1.442695, %v2037_v51 }
0x119b   :  { %3365 = vpow2.f32 %v2650_v57 }
0x119c   :  { %3367 = vpow2.f32 %v2653_v58 }
0x119f   :  { %v3362_v55 = vpop.eup %3361 }
0x11a0   :  { %1872 = vrot.lane.b32.xlu0 %v3362_v55, %s3482_s14 }
0x11a4   :  { %v3364_v56 = vpop.eup %3363 }
0x11a5   :  { %2047 = vrot.lane.b32.xlu1 %v3364_v56, %s3482_s14  ;;  %v3366_v60 = vpop.eup %3365 }
0x11a6   :  { %v1866_v61 = vadd.f32 1.0, %v3366_v60  ;;  %v3368_v62 = vpop.eup %3367  ;;  %v82_v60 = vld [vmem:[#allocation7 + $0x10] sm:$0xff] }
0x11a7   :  { %v2041_v63 = vadd.f32 1.0, %v3368_v62 }
0x11a8   :  { %3369 = vrcp.f32 %v1866_v61  ;;  %v83_v61 = vld [vmem:[#allocation7 + $0x18] sm:$0xff] }
0x11a9   :  { %3371 = vrcp.f32 %v2041_v63  ;;  %v3257_v62 = vpack.c.bf16 %v83_v61, %v82_v60 }
0x11b2   :  { %v3370_v18 = vpop.eup %3369 }
0x11b3   :  { %v3372_v54 = vpop.eup %3371  ;;  %v1870_v3 = vmul.f32 %v3370_v18, %v3886_v30 }
0x11b4   :  { %v2045_v7 = vmul.f32 %v3372_v54, %v3888_v32 }
0x1212   :  { %v1873_v21 = vpop.permute.xlu0 %1872 }
0x1213   :  { %v1875_v0 = vmul.f32 %v3370_v18, %v1873_v21  ;;  %v2443_v21 = vld [vmem:[#allocation3] sm:$0xff] }
0x1215   :  { %1877 = vrot.lane.b32.xlu0 %v1875_v0, %s3483_s15  ;;  %v2444_v0 = vld [vmem:[#allocation3 + $0x8] sm:$0xff] }
0x1217   :  { %v2048_v1 = vpop.permute.xlu1 %2047 }
0x1218   :  { %v2050_v2 = vmul.f32 %v3372_v54, %v2048_v1  ;;  %v2446_v1 = vld [vmem:[#allocation3 + $0x18] sm:$0xff] }
0x121a   :  { %2052 = vrot.lane.b32.xlu1 %v2050_v2, %s3483_s15  ;;  %v2447_v2 = vld [vmem:[#allocation3 + $0x20] sm:$0xff] }
0x1287   :  { %v1878_v4 = vpop.permute.xlu0 %1877 }
0x1288   :  { %v3926_v5 = vadd.f32 %v1878_v4, %v1870_v3 }
0x128a   :  { %3373 = vtanh.f32 %v3926_v5 }
0x128c   :  { %v2053_v9 = vpop.permute.xlu1 %2052 }
0x128d   :  { %v3930_v10 = vadd.f32 %v2053_v9, %v2045_v7 }
0x128f   :  { %3375 = vtanh.f32 %v3930_v10 }
0x1294   :  { %v3374_v11 = vpop.eup %3373 }
0x1295   :  { %1883 = vrot.lane.b32.xlu0 %v3374_v11, %s3482_s14 }
0x1299   :  { %v3376_v12 = vpop.eup %3375 }
0x129a   :  { %2058 = vrot.lane.b32.xlu1 %v3376_v12, %s3482_s14  ;;  %v3402_v12 = vld [vmem:[%s4019_s6] ss:$0 sm:$0xff]  ;;  %s3484_s6 = smov [#allocation9]  }
0x1307   :  { %v1884_v15 = vpop.permute.xlu0 %1883 }
0x1308   :  { %v1886_v17 = vmul.f32 %v3370_v18, %v1884_v15 }
0x130a   :  { %1888 = vrot.lane.b32.xlu0 %v1886_v17, %s3483_s15  ;;  %v2661_v17 = vld [vmem:[%s4021_s8] ss:$0 sm:$0xff]  ;;  %s2599_s8 = sshll.u32 %s3484_s6, 4  ;;  %s2600_s8 = int_to_ptr.vmem [resolvable:$true] %s2599_s8 }
0x130b   :  { %s3447_s5 = scalar_lea.vmem %s2600_s8, 1024  ;;  %p3452_p3 = scmp.lt.s32.totalorder %s2600_s8, %s2600_s8 }
0x130c   :  { %v2059_v20 = vpop.permute.xlu1 %2058  ;;  %p3448_p2 = scmp.ne.s32.totalorder %s2600_s8, %s3447_s5  ;;  %p3453_p4 = scmp.lt.s32.totalorder %s3447_s5, %s3447_s5 }
0x130d   :  { %v2061_v22 = vmul.f32 %v3372_v54, %v2059_v20  ;;  %v2445_v54 = vld [vmem:[#allocation3 + $0x10] sm:$0xff] }
0x130e   :  { %p3454_p5 = por %p3453_p4, %p3452_p3 }
0x130f   :  { %2063 = vrot.lane.b32.xlu1 %v2061_v22, %s3483_s15 }
0x1310   :  { %p3455_p6 = pnand %p3454_p5, %p3448_p2 }
0x137c   :  { %v1889_v23 = vpop.permute.xlu0 %1888 }
0x137d   :  { %1892 = vst.msk [vmem:[#allocation3 + $0x28] sm:$0xff] %vm243_vm3, %v1889_v23  ;;  %3043 = vmatmul.mubr.msk.f32.vlgmr.msra.gmra.mrb[24].mxu1 %vm243_vm3, %v1889_v23 }
0x137e   :  { %3237 = vmatpush3.bf16.msra.mxu1 %v3586_v6  ;;  %3064 = vmatprep.mubr.msk.f32.mxu1 %vm3480_vm2, %v3481_v14 }
0x137f   :  { %3238 = vmatprep.subr.bf16.mxu1 %v3479_v8 }
0x1381   :  { %v2064_v24 = vpop.permute.xlu1 %2063 }
0x1382   :  { %3240 = vmatpush3.bf16.msra.mxu1 %v3608_v13  ;;  %3054 = vmatmul.mubr.msk.f32.vlgmr.msra.gmra.mrb[22].mxu0 %vm243_vm3, %v2064_v24 }
0x1383   :  { %3243 = vmatpush3.bf16.msra.mxu0 %v3644_v39  ;;  %3247 = vmatprep.subr.bf16.mxu1 %v3479_v8 }
0x1384   :  { %3244 = vmatprep.subr.bf16.mxu0 %v3479_v8  ;;  %3075 = vmatprep.mubr.msk.f32.mxu0 %vm3480_vm2, %v3481_v14  ;;  %v2448_v3 = vld [vmem:[#allocation3 + $0x28] sm:$0xff] }
0x1385   :  { %3065 = vmatmul.mubr.msk.f32.vlgmr.msra.gmra.mrb[26].mxu1 %vm243_vm3, %v2064_v24 }
0x1386   :  { %3249 = vmatpush3.bf16.msra.mxu1 %v3652_v43  ;;  %3086 = vmatprep.mubr.msk.f32.mxu1 %vm3480_vm2, %v3481_v14  ;;  %v232_v43 = vadd.f32 %v3401_v27, %v3634_v19 }
0x1387   :  { %3246 = vmatpush3.bf16.msra.mxu0 %v3664_v47  ;;  %3250 = vmatprep.subr.bf16.mxu1 %v3479_v8 }
0x1388   :  { %3254 = vmatprep.subr.bf16.mxu0 %v3253_v50 }
0x138a   :  { %3252 = vmatpush3.bf16.msra.mxu1 %v3672_v49 }
0x1450   :  { %v2031_v6 = vpop.f32.mrb[24].mxu1 }
0x1451   :  { %v3044_v13 = vpop.f32.mrb[25].mxu1 }
0x1455   :  { %v2133_v39 = vpop.f32.mrb[22].mxu0 }
0x1456   :  { %v2134_v25 = vadd.f32 %v2133_v39, %v2031_v6  ;;  %v3055_v26 = vpop.f32.mrb[23].mxu0 }
0x1458   :  { %v2137_v28 = vadd.f32 %v3714_v59, %v2134_v25  ;;  %v2234_v14 = vpop.f32.mrb[26].mxu1 }
0x1459   :  { %v2312_v29 = vadd.f32 %v2234_v14, %v232_v43  ;;  %v3066_v47 = vpop.f32.mrb[27].mxu1 }
0x145a   :  { %3377 = vtanh.f32 %v2137_v28  ;;  %v2655_v30 = vmul.f32 -1.442695, %v2137_v28 }
0x145b   :  { %3379 = vtanh.f32 %v2312_v29  ;;  %v2658_v31 = vmul.f32 -1.442695, %v2312_v29 }
0x145c   :  { %3381 = vpow2.f32 %v2655_v30 }
0x145d   :  { %3383 = vpow2.f32 %v2658_v31 }
0x1464   :  { %v3378_v8 = vpop.eup %3377 }
0x1465   :  { %v3380_v49 = vpop.eup %3379  ;;  %2147 = vrot.lane.b32.xlu0 %v3378_v8, %s3482_s14 }
0x1466   :  { %2322 = vrot.lane.b32.xlu1 %v3380_v49, %s3482_s14  ;;  %v3382_v32 = vpop.eup %3381 }
0x1467   :  { %v3384_v33 = vpop.eup %3383  ;;  %v2141_v19 = vadd.f32 1.0, %v3382_v32 }
0x1468   :  { %v2316_v34 = vadd.f32 1.0, %v3384_v33 }
0x1469   :  { %3385 = vrcp.f32 %v2141_v19 }
0x146a   :  { %3387 = vrcp.f32 %v2316_v34 }
0x1473   :  { %v3386_v59 = vpop.eup %3385 }
0x1474   :  { %v3388_v36 = vpop.eup %3387  ;;  %v2145_v40 = vmul.f32 %v3386_v59, %v3926_v5 }
0x1475   :  { %v2320_v42 = vmul.f32 %v3388_v36, %v3930_v10 }
0x14d7   :  { %v2148_v16 = vpop.permute.xlu0 %2147 }
0x14d8   :  { %v2150_v35 = vmul.f32 %v3386_v59, %v2148_v16  ;;  %v2323_v37 = vpop.permute.xlu1 %2322 }
0x14d9   :  { %v2325_v38 = vmul.f32 %v3388_v36, %v2323_v37 }
0x14da   :  { %2152 = vrot.lane.b32.xlu0 %v2150_v35, %s3483_s15 }
0x14db   :  { %2327 = vrot.lane.b32.xlu1 %v2325_v38, %s3483_s15 }
0x154c   :  { %v2153_v41 = vpop.permute.xlu0 %2152 }
0x154d   :  { %v3968_v44 = vadd.f32 %v2153_v41, %v2145_v40  ;;  %v2328_v53 = vpop.permute.xlu1 %2327 }
0x154e   :  { %v2330_v45 = vadd.f32 %v2328_v53, %v2320_v42 }
0x154f   :  { %3389 = vtanh.f32 %v3968_v44 }
0x1550   :  { %3391 = vtanh.f32 %v2330_v45 }
0x1559   :  { %v3390_v51 = vpop.eup %3389 }
0x155a   :  { %v3392_v52 = vpop.eup %3391  ;;  %2158 = vrot.lane.b32.xlu0 %v3390_v51, %s3482_s14 }
0x155b   :  { %2333 = vrot.lane.b32.xlu1 %v3392_v52, %s3482_s14 }
0x15cc   :  { %v2159_v55 = vpop.permute.xlu0 %2158 }
0x15cd   :  { %v2161_v56 = vmul.f32 %v3386_v59, %v2159_v55  ;;  %v2334_v57 = vpop.permute.xlu1 %2333 }
0x15ce   :  { %v2336_v58 = vmul.f32 %v3388_v36, %v2334_v57 }
0x15cf   :  { %2163 = vrot.lane.b32.xlu0 %v2161_v56, %s3483_s15 }
0x15d0   :  { %2338 = vrot.lane.b32.xlu1 %v2336_v58, %s3483_s15 }
0x1641   :  { %v2164_v63 = vpop.permute.xlu0 %2163 }
0x1642   :  { %2167 = vst.msk [vmem:[#allocation3 + $0x30] sm:$0xff] %vm243_vm3, %v2164_v63  ;;  %v2339_v18 = vpop.permute.xlu1 %2338  ;;  %3076 = vmatmul.mubr.msk.f32.vlgmr.msra.gmra.mrb[24].mxu0 %vm243_vm3, %v2164_v63 }
0x1643   :  { %3087 = vmatmul.mubr.msk.f32.vlgmr.msra.gmra.mrb[28].mxu1 %vm243_vm3, %v2339_v18  ;;  %3256 = vmatpush3.bf16.msra.mxu0 %v3253_v50 }
0x1644   :  { %3097 = vmatprep.mubr.msk.f32.mxu0 %vm243_vm3, %v2443_v21  ;;  %3258 = vmatprep.subr.bf16.mxu0 %v3257_v62 }
0x1647   :  { %3260 = vmatpush3.bf16.msra.mxu0 %v3257_v62 }
0x1649   :  { %v2449_v4 = vld [vmem:[#allocation3 + $0x30] sm:$0xff] }
0x164a   :  { %3098 = vmatmul.mubr.msk.f32.vlgmr.msra.gmra.mrb[26].mxu0 %vm243_vm3, %v2444_v0 }
0x164b   :  { %3100 = vmatprep.mubr.msk.f32.mxu0 %vm243_vm3, %v2445_v54 }
0x164e   :  { %3101 = vmatmul.mubr.msk.f32.gmra.mrb[28].mxu0 %vm243_vm3, %v2446_v1 }
0x164f   :  { %3103 = vmatprep.mubr.msk.f32.mxu0 %vm243_vm3, %v2447_v2 }
0x1652   :  { %3104 = vmatmul.mubr.msk.f32.gmra.mrb[30].mxu0 %vm243_vm3, %v2448_v3 }
0x1653   :  { %3106 = vmatprep.mubr.msk.f32.mxu0 %vm243_vm3, %v2449_v4 }
0x1715   :  { %v2306_v5 = vpop.f32.mrb[24].mxu0 }
0x1716   :  { %v2408_v7 = vpop.f32.mrb[28].mxu1  ;;  %v3077_v9 = vpop.f32.mrb[25].mxu0 }
0x1717   :  { %v2409_v10 = vadd.f32 %v2408_v7, %v2306_v5  ;;  %v3088_v11 = vpop.f32.mrb[29].mxu1 }
0x1719   :  { %v2412_v15 = vadd.f32 %v3402_v12, %v2409_v10 }
0x171b   :  { %3393 = vtanh.f32 %v2412_v15  ;;  %v2660_v29 = vmul.f32 -1.442695, %v2412_v15 }
0x171d   :  { %v3099_v20 = vpop.f32.mrb[26].mxu0  ;;  %3395 = vpow2.f32 %v2660_v29 }
0x171e   :  { %v2553_v22 = vadd.f32 %v3099_v20, %v2661_v17  ;;  %v2547_v23 = vpop.f32.mrb[27].mxu0 }
0x171f   :  { %v2548_v24 = vadd.f32 %v2661_v17, %v2547_v23 }
0x1720   :  { %2587 = vst [vmem:[#allocation9 + $0x8] sm:$0xff] %v2553_v22 }
0x1721   :  { %2586 = vst [vmem:[#allocation9] sm:$0xff] %v2548_v24  ;;  %v3102_v6 = vpop.f32.mrb[28].mxu0 }
0x1722   :  { %v2563_v13 = vadd.f32 %v3102_v6, %v2661_v17  ;;  %v2557_v39 = vpop.f32.mrb[29].mxu0 }
0x1723   :  { %v2558_v25 = vadd.f32 %v2661_v17, %v2557_v39 }
0x1724   :  { %2589 = vst [vmem:[#allocation9 + $0x18] sm:$0xff] %v2563_v13 }
0x1725   :  { %v3394_v26 = vpop.eup %3393  ;;  %2588 = vst [vmem:[#allocation9 + $0x10] sm:$0xff] %v2558_v25  ;;  %v3105_v27 = vpop.f32.mrb[30].mxu0 }
0x1726   :  { %v2573_v43 = vadd.f32 %v3105_v27, %v2661_v17  ;;  %v2567_v28 = vpop.f32.mrb[31].mxu0  ;;  %2422 = vrot.lane.b32.xlu0 %v3394_v26, %s3482_s14 }
0x1727   :  { %v2568_v14 = vadd.f32 %v2661_v17, %v2567_v28  ;;  %v3396_v47 = vpop.eup %3395 }
0x1728   :  { %2591 = vst [vmem:[#allocation9 + $0x28] sm:$0xff] %v2573_v43  ;;  %v2416_v8 = vadd.f32 1.0, %v3396_v47 }
0x1729   :  { %2590 = vst [vmem:[#allocation9 + $0x20] sm:$0xff] %v2568_v14 }
0x172a   :  { %3397 = vrcp.f32 %v2416_v8 }
0x1734   :  { %v3398_v49 = vpop.eup %3397 }
0x1735   :  { %v2420_v32 = vmul.f32 %v3398_v49, %v3968_v44 }
0x1798   :  { %v2423_v30 = vpop.permute.xlu0 %2422 }
0x1799   :  { %v2425_v31 = vmul.f32 %v3398_v49, %v2423_v30 }
0x179b   :  { %2427 = vrot.lane.b32.xlu1 %v2425_v31, %s3483_s15 }
0x180d   :  { %v2428_v33 = vpop.permute.xlu1 %2427 }
0x180e   :  { %v2430_v19 = vadd.f32 %v2428_v33, %v2420_v32 }
0x1810   :  { %3399 = vtanh.f32 %v2430_v19 }
0x181a   :  { %v3400_v34 = vpop.eup %3399 }
0x181b   :  { %2433 = vrot.lane.b32.xlu0 %v3400_v34, %s3482_s14 }
0x188d   :  { %v2434_v59 = vpop.permute.xlu0 %2433 }
0x188e   :  { %v2436_v16 = vmul.f32 %v3398_v49, %v2434_v59 }
0x1890   :  { %2438 = vrot.lane.b32.xlu1 %v2436_v16, %s3483_s15 }
0x1902   :  { %v2439_v36 = vpop.permute.xlu1 %2438 }
0x1903   :  { %2442 = vst.msk [vmem:[#allocation3 + $0x38] sm:$0xff] %vm243_vm3, %v2439_v36 }
0x190a   :  { %v2450_v35 = vld [vmem:[#allocation3 + $0x38] sm:$0xff] }
0x190b   :  { %3107 = vmatmul.mubr.msk.f32.gmra.mrb[32].mxu0 %vm243_vm3, %v2450_v35 }
0x19de   :  { %v3108_v37 = vpop.f32.mrb[32].mxu0 }
0x19df   :  { %v2583_v38 = vadd.f32 %v3108_v37, %v2661_v17  ;;  %v2577_v40 = vpop.f32.mrb[33].mxu0 }
0x19e0   :  { %v2578_v41 = vadd.f32 %v2661_v17, %v2577_v40 }
0x19e1   :  { %2593 = vst [vmem:[#allocation9 + $0x38] sm:$0xff] %v2583_v38 }
0x19e2   :  { %2592 = vst [vmem:[#allocation9 + $0x30] sm:$0xff] %v2578_v41 }
0x19e3   :  { %3458 = shalt.err (!%p3455_p6)
}
0x19e4   :  { %s3459_s13 = scalar_lea.hbm %s4022_s9, 1024 }
0x19e5   :  { %p3460_p7 = scmp.ne.s32.totalorder %s4022_s9, %s3459_s13  ;;  %p3463_p8 = scmp.lt.u32.totalorder %s3459_s13, %s4022_s9 }
0x19e7   :  { %p3465_p9 = pnand %p3463_p8, %p3460_p7 }
0x19e9   :  { %3468 = shalt.err (!%p3465_p9)
}
0x19ea   :  { %2605 = dma.vmem_to_hbm [thread:$0]  %s2600_s8, 1024, %s4022_s9, [#allocation6], %s3476_s19, %s3476_s19, %s3477_s20  }
0x19eb   :  { %3473 = dma.done.wait [#allocation6], 1024  }
0x19ec   :  { %3474 = vsyncadd [#allocation6], 4294966272 }
0x19ed   :  { %2609 = vsyncpa [#allocation5], 1 }
0x19ee   :  { %2610 = vsyncpa [#allocation8], 1 }
0x19ef   :  { %2611 = vsyncpa [#allocation6], 1 }

</bundles_post_ra>
